<compile_context>
chip_gen: v7x
topology: tpu7x:2x2x1
jax: 0.10.0
libtpu: 0.0.40
codegen_flags: <defaults>
</compile_context>

<pallas_src>
import functools
import jax
import jax.numpy as jnp
import numpy as np
from jax.experimental import pallas as pl
from jax.experimental.pallas import tpu as pltpu


# ------------------------------ fused MoE kernel --------------------------------
def _moe_kernel(x_ref, sel_ref, keys_ref, vals_ref, o_ref, w_sc, acc_ref, *, n_heads):
    e = pl.program_id(1)                        # expert index
    c = pl.program_id(2)                        # expert_size chunk index
    n_exp = pl.num_programs(1)
    n_chunks = pl.num_programs(2)

    # --- once per token tile: router (sigmoid gates + iterative top-k) + acc init ---
    @pl.when(jnp.logical_and(e == 0, c == 0))
    def _():
        acc_ref[...] = jnp.zeros_like(acc_ref)
        logits = jnp.dot(x_ref[...], sel_ref[...],
                         preferred_element_type=jnp.float32)           # (tm, NE) f32
        gates = jax.nn.sigmoid(logits)
        ne = gates.shape[-1]
        eidx = jax.lax.broadcasted_iota(jnp.int32, gates.shape, 1)
        masked = gates
        w = jnp.zeros_like(gates)
        # iterative top-k: pick current max (lowest index on exact ties), keep its
        # gate value, mask it out.  Order is irrelevant because the output is a
        # weighted sum over the selected experts.
        for _ in range(n_heads):
            m = jnp.max(masked, axis=-1, keepdims=True)
            amin = jnp.min(jnp.where(masked == m, eidx, ne), axis=-1, keepdims=True)
            pick = eidx == amin
            w = jnp.where(pick, gates, w)
            masked = jnp.where(pick, -jnp.inf, masked)
        w_sc[...] = w                                                   # (tm, NE) f32

    # --- per-expert gate column (tm, 1): gate value if expert e selected, else 0 ---
    we = w_sc[...]
    eidx = jax.lax.broadcasted_iota(jnp.int32, we.shape, 1)
    col = jnp.sum(jnp.where(eidx == e, we, 0.0), axis=-1, keepdims=True)

    # --- expert FF chunk: relu(x @ keys[e][:, chunk]) @ values[e][chunk, :] ---
    k = keys_ref[0]                                                     # (D, tes)  bf16
    v = vals_ref[0]                                                     # (tes, Vp) bf16
    s = jnp.maximum(jnp.dot(x_ref[...], k, preferred_element_type=jnp.float32), 0.0)
    acc_ref[...] += col * jnp.dot(s.astype(v.dtype), v,
                                  preferred_element_type=jnp.float32)
    # TODO(synk): for large n_experts / small tiles, scalar-prefetch per-tile active
    # expert id lists and use a data-dependent keys/values index_map so unselected
    # experts are neither DMA'd nor matmul'd (cvmm-style grouping).  At n_heads=2 of
    # 8 experts with tm=128 essentially every expert is active per tile, so the dense
    # expert loop is already near-optimal here.

    @pl.when(jnp.logical_and(e == n_exp - 1, c == n_chunks - 1))
    def _():
        o_ref[...] = acc_ref[...].astype(o_ref.dtype)


# ----------------------------------- wrapper ------------------------------------
def moe_forward(x, expert_sel, keys, values, n_heads, *, tm=128, tes=None,
                compute_dtype=jnp.bfloat16):
    """x: [B, S, D] float32. Returns [B, S, v_dim] float32."""
    B, S, D = x.shape
    n_experts, _, expert_size = keys.shape
    v_dim = values.shape[-1]

    # expert_size chunking (bounds VMEM for the weight blocks, e.g. on v7x)
    if tes is None:
        tes = min(expert_size, 512)
        if expert_size % tes != 0:
            tes = expert_size
    assert expert_size % tes == 0

    T = B * S
    n_tiles = pl.cdiv(T, tm)
    T_pad = n_tiles * tm
    V_pad = ((v_dim + 127) // 128) * 128        # lane-dense output stores

    # wrapper-side layout / dtype plumbing (bf16 MXU inputs, f32 accumulation in-kernel)
    x2 = x.reshape(T, D).astype(compute_dtype)
    if T_pad != T:
        x2 = jnp.pad(x2, ((0, T_pad - T), (0, 0)))
    sel_t = jnp.transpose(expert_sel).astype(compute_dtype)             # [D, NE]
    keys_c = keys.astype(compute_dtype)                                 # [NE, D, ES]
    vals_c = values.astype(compute_dtype)                               # [NE, ES, V]
    if V_pad != v_dim:
        vals_c = jnp.pad(vals_c, ((0, 0), (0, 0), (0, V_pad - v_dim)))

    grid = (n_tiles, n_experts, expert_size // tes)

    out = pl.pallas_call(
        functools.partial(_moe_kernel, n_heads=n_heads),
        out_shape=jax.ShapeDtypeStruct((T_pad, V_pad), jnp.float32),
        grid_spec=pltpu.PrefetchScalarGridSpec(
            num_scalar_prefetch=0,
            grid=grid,
            in_specs=[
                # x tile: resident across the expert / chunk axes (no re-DMA)
                pl.BlockSpec((tm, D), lambda i, e, c: (i, 0)),
                # pre-transposed selection matrix, resident across the whole grid
                pl.BlockSpec((D, n_experts), lambda i, e, c: (0, 0)),
                # per-(expert, chunk) weight blocks, streamed & double-buffered
                pl.BlockSpec((1, D, tes), lambda i, e, c: (e, 0, c)),
                pl.BlockSpec((1, tes, V_pad), lambda i, e, c: (e, c, 0)),
            ],
            out_specs=pl.BlockSpec((tm, V_pad), lambda i, e, c: (i, 0)),
            scratch_shapes=[
                pltpu.VMEM((tm, n_experts), jnp.float32),   # dense top-k gate weights
                pltpu.VMEM((tm, V_pad), jnp.float32),       # f32 accumulator
            ],
        ),
        compiler_params=pltpu.CompilerParams(
            dimension_semantics=("parallel", "arbitrary", "arbitrary"),
            vmem_limit_bytes=64 * 1024 * 1024,
        ),
    )(x2, sel_t, keys_c, vals_c)

    return out[:T, :v_dim].reshape(B, S, v_dim)


# -------------------------------- pure-JAX reference -----------------------------
def moe_reference(x, expert_sel, keys, values, n_heads, compute_dtype=jnp.bfloat16):
    """Same math as the module's eval forward, mirroring the kernel's bf16 MXU-input
    casts (f32 accumulation) so the comparison isolates kernel logic."""
    B, S, D = x.shape
    n_experts = keys.shape[0]
    x2 = x.reshape(-1, D).astype(compute_dtype)
    sel_t = jnp.transpose(expert_sel).astype(compute_dtype)
    gates = jax.nn.sigmoid(jnp.dot(x2, sel_t, preferred_element_type=jnp.float32))
    val, idx = jax.lax.top_k(gates, n_heads)
    wmask = jnp.sum(jax.nn.one_hot(idx, n_experts, dtype=jnp.float32)
                    * val[..., None], axis=1)                           # (T, NE)
    kc = keys.astype(compute_dtype)
    vc = values.astype(compute_dtype)
    h = jnp.maximum(jnp.einsum('td,nde->tne', x2, kc,
                               preferred_element_type=jnp.float32), 0.0)
    out = jnp.einsum('tne,nev,tn->tv', h.astype(compute_dtype), vc, wmask,
                     preferred_element_type=jnp.float32)
    return out.reshape(B, S, values.shape[-1])


if __name__ == "__main__":
    # Small shapes consistent with the module
    dmodel = 32
    n_experts = 8
    expert_size = 32
    n_heads = 2
    v_dim = dmodel
    weight_scale = 1.0
    B, S = 2, 8

    key = jax.random.PRNGKey(0)
    k1, k2, k3, k4 = jax.random.split(key, 4)

    # deterministic parameter init, matching __init__ std scaling
    keys_p = jax.random.normal(k1, (n_experts, dmodel, expert_size), jnp.float32) \
        * (dmodel ** -0.5 * weight_scale)
    values_p = jax.random.normal(k2, (n_experts, expert_size, v_dim), jnp.float32) \
        * ((n_experts * expert_size) ** -0.5 * weight_scale)
    expert_sel_p = jax.random.normal(k3, (n_experts, dmodel), jnp.float32) \
        * (dmodel ** -0.5 * weight_scale)

    x = jax.random.normal(k4, (B, S, dmodel), jnp.float32)

    out = moe_forward(x, expert_sel_p, keys_p, values_p, n_heads)
    out = jax.block_until_ready(out)

    ref = moe_reference(x, expert_sel_p, keys_p, values_p, n_heads)
    np.testing.assert_allclose(np.asarray(out), np.asarray(ref), rtol=2e-2, atol=2e-2)

    print("KERNEL_OK")
</pallas_src>

<mosaic_0001>
module attributes {stable_mosaic.version = 11 : i64} {
  func.func @_moe_kernel(%arg0: i32, %arg1: i32, %arg2: i32, %arg3: memref<128x32xbf16, #tpu.memory_space<vmem>>, %arg4: memref<32x8xbf16, #tpu.memory_space<vmem>>, %arg5: memref<1x32x32xbf16, #tpu.memory_space<vmem>>, %arg6: memref<1x32x128xbf16, #tpu.memory_space<vmem>>, %arg7: memref<128x128xf32, #tpu.memory_space<vmem>>, %arg8: memref<128x8xf32, #tpu.memory_space<vmem>>, %arg9: memref<128x128xf32, #tpu.memory_space<vmem>>) attributes {dimension_semantics = [#tpu.dimension_semantics<parallel>, #tpu.dimension_semantics<arbitrary>, #tpu.dimension_semantics<arbitrary>], iteration_bounds = array<i64: 1, 8, 1>, scalar_prefetch = 0 : i64, scratch_operands = 2 : i64, tpu.core_type = #tpu.core_type<tc>, window_params = [{transform_indices = @transform_0, window_bounds = array<i64: 128, 32>}, {pipeline_mode = #tpu.pipeline_mode<synchronous>, transform_indices = @transform_1, window_bounds = array<i64: 32, 8>}, {transform_indices = @transform_2, window_bounds = array<i64: 1, 32, 32>}, {transform_indices = @transform_3, window_bounds = array<i64: 1, 32, 128>}, {transform_indices = @transform_4, window_bounds = array<i64: 128, 128>}]} {
    %c0_i32 = arith.constant 0 : i32
    %0 = arith.cmpi eq, %arg1, %c0_i32 : i32
    %c0_i32_0 = arith.constant 0 : i32
    %1 = arith.cmpi eq, %arg2, %c0_i32_0 : i32
    %2 = arith.andi %0, %1 : i1
    %3 = arith.extui %2 : i1 to i32
    %c0_i32_1 = arith.constant 0 : i32
    %4 = arith.cmpi ne, %3, %c0_i32_1 : i32
    scf.if %4 {
      %cst_21 = arith.constant 0.000000e+00 : f32
      %33 = vector.broadcast %cst_21 : f32 to vector<128x128xf32>
      %c0_22 = arith.constant 0 : index
      %c0_23 = arith.constant 0 : index
      %34 = vector.load %arg9[%c0_22, %c0_23] : memref<128x128xf32, #tpu.memory_space<vmem>>, vector<128x128xf32>
      tpu.vector_store %arg9[%c0_22, %c0_23], %33 {strides = array<i32>} : memref<128x128xf32, #tpu.memory_space<vmem>>, vector<128x128xf32>,
      %c0_24 = arith.constant 0 : index
      %c0_25 = arith.constant 0 : index
      %35 = vector.load %arg3[%c0_24, %c0_25] : memref<128x32xbf16, #tpu.memory_space<vmem>>, vector<128x32xbf16>
      %c0_26 = arith.constant 0 : index
      %c0_27 = arith.constant 0 : index
      %36 = vector.load %arg4[%c0_26, %c0_27] : memref<32x8xbf16, #tpu.memory_space<vmem>>, vector<32x8xbf16>
      %cst_28 = arith.constant dense<0.000000e+00> : vector<128x8xf32>
      %37 = tpu.matmul %35, %36, %cst_28 {dimension_numbers = #tpu.dot_dimension_numbers<[1], [0], [0], [1], [0, 0, 1, 1], [], []>} : vector<128x32xbf16>, vector<32x8xbf16>, vector<128x8xf32> -> vector<128x8xf32>
      %38 = arith.negf %37 : vector<128x8xf32>
      %39 = math.exp %38 : vector<128x8xf32>
      %cst_29 = arith.constant 1.000000e+00 : f32
      %40 = vector.broadcast %cst_29 : f32 to vector<128x8xf32>
      %41 = arith.addf %40, %39 : vector<128x8xf32>
      %42 = arith.divf %40, %41 : vector<128x8xf32>
      %43 = tpu.iota {dimensions = array<i32: 1>} : vector<128x8xi32>
      %cst_30 = arith.constant 0.000000e+00 : f32
      %44 = vector.broadcast %cst_30 : f32 to vector<128x8xf32>
      %cst_31 = arith.constant dense<0xFF800000> : vector<128xf32>
      %45 = vector.multi_reduction <maximumf>, %42, %cst_31 [1] : vector<128x8xf32> to vector<128xf32>
      %46 = vector.shape_cast %45 : vector<128xf32> to vector<128x1xf32>
      %47 = vector.broadcast %46 : vector<128x1xf32> to vector<128x8xf32>
      %48 = arith.cmpf oeq, %42, %47 : vector<128x8xf32>
      %c8_i32 = arith.constant 8 : i32
      %49 = vector.broadcast %c8_i32 : i32 to vector<128x8xi32>
      %50 = arith.select %48, %43, %49 : vector<128x8xi1>, vector<128x8xi32>
      %cst_32 = arith.constant dense<2147483647> : vector<128xi32>
      %51 = vector.multi_reduction <minsi>, %50, %cst_32 [1] : vector<128x8xi32> to vector<128xi32>
      %52 = vector.shape_cast %51 : vector<128xi32> to vector<128x1xi32>
      %53 = vector.broadcast %52 : vector<128x1xi32> to vector<128x8xi32>
      %54 = arith.cmpi eq, %43, %53 : vector<128x8xi32>
      %55 = arith.select %54, %42, %44 : vector<128x8xi1>, vector<128x8xf32>
      %cst_33 = arith.constant 0xFF800000 : f32
      %56 = vector.broadcast %cst_33 : f32 to vector<128x8xf32>
      %57 = arith.select %54, %56, %42 : vector<128x8xi1>, vector<128x8xf32>
      %cst_34 = arith.constant dense<0xFF800000> : vector<128xf32>
      %58 = vector.multi_reduction <maximumf>, %57, %cst_34 [1] : vector<128x8xf32> to vector<128xf32>
      %59 = vector.shape_cast %58 : vector<128xf32> to vector<128x1xf32>
      %60 = vector.broadcast %59 : vector<128x1xf32> to vector<128x8xf32>
      %61 = arith.cmpf oeq, %57, %60 : vector<128x8xf32>
      %c8_i32_35 = arith.constant 8 : i32
      %62 = vector.broadcast %c8_i32_35 : i32 to vector<128x8xi32>
      %63 = arith.select %61, %43, %62 : vector<128x8xi1>, vector<128x8xi32>
      %cst_36 = arith.constant dense<2147483647> : vector<128xi32>
      %64 = vector.multi_reduction <minsi>, %63, %cst_36 [1] : vector<128x8xi32> to vector<128xi32>
      %65 = vector.shape_cast %64 : vector<128xi32> to vector<128x1xi32>
      %66 = vector.broadcast %65 : vector<128x1xi32> to vector<128x8xi32>
      %67 = arith.cmpi eq, %43, %66 : vector<128x8xi32>
      %68 = arith.select %67, %42, %55 : vector<128x8xi1>, vector<128x8xf32>
      %c0_37 = arith.constant 0 : index
      %c0_38 = arith.constant 0 : index
      %69 = vector.load %arg8[%c0_37, %c0_38] : memref<128x8xf32, #tpu.memory_space<vmem>>, vector<128x8xf32>
      tpu.vector_store %arg8[%c0_37, %c0_38], %68 {strides = array<i32>} : memref<128x8xf32, #tpu.memory_space<vmem>>, vector<128x8xf32>,
    } else {
    }
    %c0 = arith.constant 0 : index
    %c0_2 = arith.constant 0 : index
    %5 = vector.load %arg8[%c0, %c0_2] : memref<128x8xf32, #tpu.memory_space<vmem>>, vector<128x8xf32>
    %6 = tpu.iota {dimensions = array<i32: 1>} : vector<128x8xi32>
    %7 = vector.broadcast %arg1 : i32 to vector<128x8xi32>
    %8 = arith.cmpi eq, %6, %7 : vector<128x8xi32>
    %cst = arith.constant 0.000000e+00 : f32
    %9 = vector.broadcast %cst : f32 to vector<128x8xf32>
    %10 = arith.select %8, %5, %9 : vector<128x8xi1>, vector<128x8xf32>
    %cst_3 = arith.constant dense<0.000000e+00> : vector<128xf32>
    %11 = vector.multi_reduction <add>, %10, %cst_3 [1] : vector<128x8xf32> to vector<128xf32>
    %12 = vector.shape_cast %11 : vector<128xf32> to vector<128x1xf32>
    %c0_4 = arith.constant 0 : index
    %c0_5 = arith.constant 0 : index
    %c0_6 = arith.constant 0 : index
    %13 = vector.load %arg5[%c0_4, %c0_5, %c0_6] : memref<1x32x32xbf16, #tpu.memory_space<vmem>>, vector<1x32x32xbf16>
    %14 = vector.shape_cast %13 : vector<1x32x32xbf16> to vector<32x32xbf16>
    %c0_7 = arith.constant 0 : index
    %c0_8 = arith.constant 0 : index
    %c0_9 = arith.constant 0 : index
    %15 = vector.load %arg6[%c0_7, %c0_8, %c0_9] : memref<1x32x128xbf16, #tpu.memory_space<vmem>>, vector<1x32x128xbf16>
    %16 = vector.shape_cast %15 : vector<1x32x128xbf16> to vector<32x128xbf16>
    %c0_10 = arith.constant 0 : index
    %c0_11 = arith.constant 0 : index
    %17 = vector.load %arg3[%c0_10, %c0_11] : memref<128x32xbf16, #tpu.memory_space<vmem>>, vector<128x32xbf16>
    %cst_12 = arith.constant dense<0.000000e+00> : vector<128x32xf32>
    %18 = tpu.matmul %17, %14, %cst_12 {dimension_numbers = #tpu.dot_dimension_numbers<[1], [0], [0], [1], [0, 0, 1, 1], [], []>} : vector<128x32xbf16>, vector<32x32xbf16>, vector<128x32xf32> -> vector<128x32xf32>
    %cst_13 = arith.constant 0.000000e+00 : f32
    %19 = vector.broadcast %cst_13 : f32 to vector<128x32xf32>
    %20 = arith.maximumf %18, %19 : vector<128x32xf32>
    %c0_14 = arith.constant 0 : index
    %c0_15 = arith.constant 0 : index
    %21 = vector.load %arg9[%c0_14, %c0_15] : memref<128x128xf32, #tpu.memory_space<vmem>>, vector<128x128xf32>
    %22 = arith.truncf %20 : vector<128x32xf32> to vector<128x32xbf16>
    %cst_16 = arith.constant dense<0.000000e+00> : vector<128x128xf32>
    %23 = tpu.matmul %22, %16, %cst_16 {dimension_numbers = #tpu.dot_dimension_numbers<[1], [0], [0], [1], [0, 0, 1, 1], [], []>} : vector<128x32xbf16>, vector<32x128xbf16>, vector<128x128xf32> -> vector<128x128xf32>
    %24 = vector.broadcast %12 : vector<128x1xf32> to vector<128x128xf32>
    %25 = arith.mulf %24, %23 : vector<128x128xf32>
    %26 = arith.addf %21, %25 : vector<128x128xf32>
    %c0_17 = arith.constant 0 : index
    %c0_18 = arith.constant 0 : index
    %27 = vector.load %arg9[%c0_17, %c0_18] : memref<128x128xf32, #tpu.memory_space<vmem>>, vector<128x128xf32>
    tpu.vector_store %arg9[%c0_17, %c0_18], %26 {strides = array<i32>} : memref<128x128xf32, #tpu.memory_space<vmem>>, vector<128x128xf32>,
    %c7_i32 = arith.constant 7 : i32
    %28 = arith.cmpi eq, %arg1, %c7_i32 : i32
    %c0_i32_19 = arith.constant 0 : i32
    %29 = arith.cmpi eq, %arg2, %c0_i32_19 : i32
    %30 = arith.andi %28, %29 : i1
    %31 = arith.extui %30 : i1 to i32
    %c0_i32_20 = arith.constant 0 : i32
    %32 = arith.cmpi ne, %31, %c0_i32_20 : i32
    scf.if %32 {
      %c0_21 = arith.constant 0 : index
      %c0_22 = arith.constant 0 : index
      %33 = vector.load %arg9[%c0_21, %c0_22] : memref<128x128xf32, #tpu.memory_space<vmem>>, vector<128x128xf32>
      %c0_23 = arith.constant 0 : index
      %c0_24 = arith.constant 0 : index
      %34 = vector.load %arg7[%c0_23, %c0_24] : memref<128x128xf32, #tpu.memory_space<vmem>>, vector<128x128xf32>
      tpu.vector_store %arg7[%c0_23, %c0_24], %33 {strides = array<i32>} : memref<128x128xf32, #tpu.memory_space<vmem>>, vector<128x128xf32>,
    } else {
    }
    return
  }
  func.func @transform_0(%arg0: i32, %arg1: i32, %arg2: i32) -> (i32, i32) {
    %c0_i32 = arith.constant 0 : i32
    %c0_i32_0 = arith.constant 0 : i32
    return %arg0, %c0_i32 : i32, i32
  }
  func.func @transform_1(%arg0: i32, %arg1: i32, %arg2: i32) -> (i32, i32) {
    %c0_i32 = arith.constant 0 : i32
    %c0_i32_0 = arith.constant 0 : i32
    %c0_i32_1 = arith.constant 0 : i32
    return %c0_i32, %c0_i32_0 : i32, i32
  }
  func.func @transform_2(%arg0: i32, %arg1: i32, %arg2: i32) -> (i32, i32, i32) {
    %c0_i32 = arith.constant 0 : i32
    %c0_i32_0 = arith.constant 0 : i32
    return %arg1, %c0_i32, %arg2 : i32, i32, i32
  }
  func.func @transform_3(%arg0: i32, %arg1: i32, %arg2: i32) -> (i32, i32, i32) {
    %c0_i32 = arith.constant 0 : i32
    %c0_i32_0 = arith.constant 0 : i32
    return %arg1, %arg2, %c0_i32 : i32, i32, i32
  }
  func.func @transform_4(%arg0: i32, %arg1: i32, %arg2: i32) -> (i32, i32) {
    %c0_i32 = arith.constant 0 : i32
    %c0_i32_0 = arith.constant 0 : i32
    return %arg0, %c0_i32 : i32, i32
  }
}

</mosaic_0001>

<bundles_post_ra>
// kernel: tpu_custom_call.1
= control target key start
LH: loop header
LB: loop body
LE: loop exit
PB: predicated region body
PF: predicated region fallthrough
CT: control target
= control target key end

     0   :  { %s3830_s0 = inlined_call_operand.hbm [shape: bf16[128,32], index: 0, kind: input, shape index: {}]   ;;  %s3831_s1 = inlined_call_operand.hbm [shape: bf16[32,8], index: 1, kind: input, shape index: {}]   ;;  %s3832_s2 = inlined_call_operand.hbm [shape: bf16[8,32,32], index: 2, kind: input, shape index: {}]   ;;  %s3833_s3 = inlined_call_operand.hbm [shape: bf16[8,32,128], index: 3, kind: input, shape index: {}]   ;;  %s3834_s4 = inlined_call_operand.hbm [shape: f32[128,128], index: 4, kind: output, shape index: {}]  }
   0x1   :  { %3867 = sst [smem:[#allocation29_spill]] %s3830_s0 }
   0x2   :  { %3868 = sst [smem:[#allocation30_spill]] %s3832_s2 }
   0x3   :  { %9 = vsyncpa [#allocation5], 0 }
   0x4   :  { %10 = vsyncpa [#allocation8], 0 }
   0x5   :  { %11 = vsyncpa [#allocation6], 0  ;;  %s2627_s15 = smov 0   ;;  %s2629_s16 = smov 0  }
   0x6   :  { %s2631_s17 = smov 0   ;;  %s2633_s18 = smov 0  }
   0x7   :  { %s2635_s19 = smov 0   ;;  %s2637_s20 = smov 0  }
   0x8 LB: > { %s2656_s21 = sadd.s32 4294967295, %s2590_s20   ;;  %s92_s22 = sadd.s32 1, %s2578_s17  ;;  %s2590_s20 = sphi %s2637_s20, %s17_s20   ;;  %s2586_s19 = sphi %s2635_s19, %s3925_s19   ;;  %s2582_s18 = sphi %s2633_s18, %s3924_s18   ;;  %s2578_s17 = sphi %s2631_s17, %s3923_s17   ;;  %s2574_s16 = sphi %s2629_s16, %s3922_s16   ;;  %s2570_s15 = sphi %s2627_s15, %s3921_s15  }
   0x9   : > { %p99_p0 = scmp.ne.s32.totalorder %s2578_s17, %s2574_s16  ;;  %p100_p1 = scmp.eq.s32.totalorder %s2590_s20, 0 }
   0xa   : > { %p105_p2 = scmp.ne.s32.totalorder %s2574_s16, %s2570_s15  ;;  %p3835_p3 = scmp.eq.s32.totalorder %s2656_s21, 0 }
   0xb   : > { %p101_p4 = por %p100_p1, %p99_p0  ;;  %p2026_p5 = scmp.ge.s32.totalorder %s2590_s20, 1 }
   0xc   : > { %p2667_p6 = por %p3835_p3, %p105_p2  ;;  %p170_p7 = scmp.lt.s32.totalorder %s2590_s20, 9 }
   0xd   : > { %s2592_s25 = smov [#allocation4]   ;;  %p2239_p10 = scmp.lt.s32.totalorder %s2590_s20, 8 }
   0xe   : > { %s3869_s23 = scalar_select %p2667_p6, 1, 0 }
   0xf   : > { %p2672_p8 = pnand %p2026_p5, %p170_p7  ;;  %s185_s26 = sshll.u32 %s2592_s25, 4  ;;  %s186_s26 = int_to_ptr.vmem [resolvable:$true] %s185_s26 }
  0x10   : > { %p2685_p12 = pnand %p2239_p10, %p101_p4  ;;  %s32_s29 = sadd.s32 1, %s2586_s19 }
  0x11   : > { %s3870_s24 = scalar_select %p2672_p8, 1, 0 }
  0x12   : > { %p2223_p9 = pneg %p2672_p8  ;;  %s3873_s0 = sld [smem:[#allocation29_spill]] }
  0x13   : > { %s3872_s28 = scalar_select %p2685_p12, 1, 0 }
  0x14   : > { %p2681_p11 = pnand %p2223_p9, %p3835_p3 }
  0x16   : > { %p3840_p0 = pneg %p2681_p11 }
  0x18   : > { %s2386_s6 = scalar_lea.hbm %s3873_s0, 1024 }
  0x19   : > { %p2387_p13 = scmp.ne.s32.totalorder %s3873_s0, %s2386_s6  ;;  %p2393_p4 = scmp.lt.u32.totalorder %s2386_s6, %s3873_s0 }
  0x1b   : > { %p2389_p1 = pnand %p3840_p0, %p2387_p13 }
  0x1d   : > { %p2390_p2 = pneg %p2389_p1 }
  0x1f   : > { %p2395_p5 = pnand %p2393_p4, %p2390_p2 }
  0x21   : > { %2398 = shalt.err (!%p2395_p5)
}
  0x22   : > { %s2399_s11 = scalar_lea.vmem %s186_s26, 1024  ;;  %p2407_p3 = scmp.lt.s32.totalorder %s186_s26, %s186_s26 }
  0x23   : > { %p2400_p7 = scmp.ne.s32.totalorder %s186_s26, %s2399_s11  ;;  %p2408_p6 = scmp.lt.s32.totalorder %s2399_s11, %s2399_s11 }
  0x25   : > { %p2402_p9 = pnand %p2400_p7, %p3840_p0  ;;  %p2409_p8 = por %p2408_p6, %p2407_p3 }
  0x27   : > { %p2403_p10 = pneg %p2402_p9 }
  0x29   : > { %p2410_p12 = pnand %p2409_p8, %p2403_p10 }
  0x2b   : > { %2413 = shalt.err (!%p2410_p12)
}
  0x2c   : > { %s2593_s12 = smov 64   ;;  %s2594_s13 = smov 4  }
  0x2d   : > { %2226 = dma.hbm_to_vmem [thread:$0]  (!%p2681_p11), %s3873_s0, 1024, %s186_s26, [#allocation5], %s2593_s12, %s2593_s12, %s2594_s13  }
  0x2e   : > { %p34_p3 = scmp.ge.s32.totalorder %s32_s29, 8  ;;  %s212_s25 = sand.u32 1, %s2590_s20  }
  0x2f   : > { %s214_s30 = sand.u32 1, %s2578_s17   ;;  %s3839_s7 = sshll.u32 %s2586_s19, 8 }
  0x30   : > { %s3927_s29 = smov (%p34_p3, %s32_s29), 0  ;;  %s2719_s5 = sshll.u32 %s214_s30, 4 }
  0x31   : > { %3874 = sst [smem:[#allocation16_spill]] %s3927_s29  ;;  %s87_s6 = ssub.s32 %s2586_s19, %s3927_s29 }
  0x32   : > { %p90_p6 = scmp.eq.s32.totalorder %s87_s6, 0  ;;  %s3875_s2 = sld [smem:[#allocation30_spill]] }
  0x33   : > { %s216_s26 = scalar_lea.vmem [#allocation9], %s2719_s5  ;;  %s2739_s15 = scalar_lea.sflag [#allocation5], %s212_s25 }
  0x34   : > { %s224_s11 = sshll.u32 %s216_s26, 4  ;;  %p3876_p12 = scmp.ne.s32.totalorder %s3872_s28, 0  ;;  %s2737_s11 = int_to_ptr.vmem [resolvable:$true] %s224_s11 }
  0x35   : > { %s2735_s14 = scalar_select %p90_p6, %s2578_s17, %s92_s22  }
  0x36   : > { %p3842_p13 = pneg %p3876_p12 }
  0x38   : > { %s2729_s10 = scalar_lea.hbm %s3875_s2, %s3839_s7  ;;  %s2419_s9 = scalar_lea.hbm %s3875_s2, 2048 }
  0x39   : > { %s2414_s30 = scalar_lea.hbm %s2729_s10, 256  ;;  %p2420_p4 = scmp.lt.u32.totalorder %s2729_s10, %s3875_s2 }
  0x3a   : > { %p2415_p8 = scmp.ne.s32.totalorder %s2729_s10, %s2414_s30  ;;  %p2421_p5 = scmp.lt.u32.totalorder %s2419_s9, %s2414_s30 }
  0x3b   : > { %p2423_p9 = scmp.lt.u32.totalorder %s2414_s30, %s2729_s10 }
  0x3c   : > { %p2417_p1 = pnand %p3842_p13, %p2415_p8  ;;  %p2422_p7 = por %p2421_p5, %p2420_p4 }
  0x3e   : > { %p2418_p2 = pneg %p2417_p1  ;;  %p2424_p10 = por %p2423_p9, %p2422_p7 }
  0x40   : > { %p2425_p3 = pnand %p2424_p10, %p2418_p2 }
  0x42   : > { %2428 = shalt.err (!%p2425_p3)
}
  0x43   : > { %s2429_s22 = scalar_lea.vmem %s2737_s11, 256  ;;  %s2595_s25 = smov [#allocation9]  }
  0x44   : > { %p2430_p6 = scmp.ne.s32.totalorder %s2737_s11, %s2429_s22  ;;  %s2434_s6 = sshll.u32 %s2595_s25, 4  ;;  %s2435_s6 = int_to_ptr.vmem [resolvable:$false] %s2434_s6 }
  0x45   : > { %s2436_s7 = scalar_lea.vmem %s2435_s6, 512  ;;  %p2437_p0 = scmp.lt.s32.totalorder %s2737_s11, %s2435_s6 }
  0x46   : > { %p2432_p8 = pnand %p2430_p6, %p3842_p13  ;;  %p2438_p4 = scmp.lt.s32.totalorder %s2436_s7, %s2429_s22 }
  0x48   : > { %p2433_p1 = pneg %p2432_p8  ;;  %p2439_p5 = por %p2438_p4, %p2437_p0 }
  0x4a   : > { %p2440_p7 = pnand %p2439_p5, %p2433_p1 }
  0x4c   : > { %2443 = shalt.err (!%p2440_p7)
}
  0x4d   : > { %2233 = dma.hbm_to_vmem [thread:$0]  (!%p3876_p12), %s2729_s10, 256, %s2737_s11, %s2739_s15, %s2593_s12, %s2593_s12, %s2594_s13  }
  0x4e   : > { %s2596_s30 = smov [#allocation7]   ;;  %s3877_s9 = sshll.u32 %s2586_s19, 8 }
  0x4f   : > { %s198_s8 = sshll.u32 %s2596_s30, 4  ;;  %s2775_s25 = scalar_lea.hbm %s3833_s3, %s3877_s9  ;;  %s199_s8 = int_to_ptr.vmem [resolvable:$true] %s198_s8 }
  0x50   : > { %s2444_s0 = scalar_lea.hbm %s3831_s1, 256  ;;  %p3878_p2 = pneg %p2681_p11 }
  0x51   : > { %p2445_p0 = scmp.ne.s32.totalorder %s3831_s1, %s2444_s0  ;;  %p2451_p3 = scmp.lt.u32.totalorder %s2444_s0, %s3831_s1 }
  0x53   : > { %p2447_p9 = pnand %p2445_p0, %p3878_p2 }
  0x55   : > { %p2448_p10 = pneg %p2447_p9 }
  0x57   : > { %p2453_p6 = pnand %p2451_p3, %p2448_p10 }
  0x59   : > { %2456 = shalt.err (!%p2453_p6)
}
  0x5a   : > { %s2457_s30 = scalar_lea.vmem %s199_s8, 256  ;;  %p3879_p1 = pmov %p3878_p2 }
  0x5b   : > { %p2458_p8 = scmp.ne.s32.totalorder %s199_s8, %s2457_s30  ;;  %p2465_p7 = scmp.lt.s32.totalorder %s199_s8, %s199_s8 }
  0x5c   : > { %p2466_p13 = scmp.lt.s32.totalorder %s2457_s30, %s2457_s30 }
  0x5d   : > { %p2460_p4 = pnand %p2458_p8, %p3879_p1 }
  0x5e   : > { %p2467_p12 = por %p2466_p13, %p2465_p7 }
  0x5f   : > { %p2461_p5 = pneg %p2460_p4 }
  0x61   : > { %p2468_p0 = pnand %p2467_p12, %p2461_p5 }
  0x63   : > { %2471 = shalt.err (!%p2468_p0)
}
  0x64   : > { %2229 = dma.hbm_to_vmem [thread:$0]  (!%p2681_p11), %s3831_s1, 256, %s199_s8, [#allocation8], %s2593_s12, %s2593_s12, %s2594_s13  }
  0x65   : > { %s238_s29 = scalar_lea.vmem [#allocation10], %s2719_s5  ;;  %s2472_s26 = scalar_lea.hbm %s2775_s25, 256 }
  0x66   : > { %s247_s9 = sshll.u32 %s238_s29, 4  ;;  %p2473_p12 = scmp.ne.s32.totalorder %s2775_s25, %s2472_s26  ;;  %s2801_s9 = int_to_ptr.vmem [resolvable:$true] %s247_s9 }
  0x67   : > { %p3880_p13 = scmp.ne.s32.totalorder %s3872_s28, 0  ;;  %s2477_s6 = scalar_lea.hbm %s3833_s3, 2048 }
  0x68   : > { %p2478_p3 = scmp.lt.u32.totalorder %s2775_s25, %s3833_s3  ;;  %p2479_p6 = scmp.lt.u32.totalorder %s2477_s6, %s2472_s26 }
  0x69   : > { %p3881_p2 = pneg %p3880_p13  ;;  %p2481_p8 = scmp.lt.u32.totalorder %s2472_s26, %s2775_s25 }
  0x6a   : > { %p2480_p11 = por %p2479_p6, %p2478_p3 }
  0x6b   : > { %p2475_p9 = pnand %p2473_p12, %p3881_p2 }
  0x6c   : > { %p2482_p1 = por %p2481_p8, %p2480_p11 }
  0x6d   : > { %p2476_p10 = pneg %p2475_p9 }
  0x6f   : > { %p2483_p4 = pnand %p2482_p1, %p2476_p10 }
  0x71   : > { %2486 = shalt.err (!%p2483_p4)
}
  0x72   : > { %s2487_s5 = scalar_lea.vmem %s2801_s9, 256  ;;  %p3882_p7 = pmov %p3881_p2 }
  0x73   : > { %p2488_p5 = scmp.ne.s32.totalorder %s2801_s9, %s2487_s5  ;;  %s2597_s8 = smov [#allocation10]  }
  0x74   : > { %s2492_s11 = sshll.u32 %s2597_s8, 4  ;;  %s2493_s11 = int_to_ptr.vmem [resolvable:$false] %s2492_s11 }
  0x75   : > { %p2490_p0 = pnand %p2488_p5, %p3882_p7  ;;  %s2494_s30 = scalar_lea.vmem %s2493_s11, 512 }
  0x76   : > { %p2495_p2 = scmp.lt.s32.totalorder %s2801_s9, %s2493_s11  ;;  %p2496_p9 = scmp.lt.s32.totalorder %s2494_s30, %s2487_s5 }
  0x77   : > { %p2491_p12 = pneg %p2490_p0 }
  0x78   : > { %p2497_p3 = por %p2496_p9, %p2495_p2 }
  0x7a   : > { %p2498_p6 = pnand %p2497_p3, %p2491_p12 }
  0x7c   : > { %2501 = shalt.err (!%p2498_p6)
}
  0x7d   : > { %2236 = dma.hbm_to_vmem [thread:$0]  (!%p3880_p13), %s2775_s25, 256, %s2801_s9, %s2739_s15, %s2593_s12, %s2593_s12, %s2594_s13  }
  0x7e   : > { %p3883_p10 = scmp.ne.s32.totalorder %s3870_s24, 0 }
  0x7f   : > { %p3884_p11 = scmp.eq.s32.totalorder (!%p3883_p10), %s2656_s21, 0 }
  0x80   : > { %259 = sbr.rel (%p3883_p10) target bundleno = 1826 (0x722), region = 36 }
  0x87   : > { %2553 = dma.done.wait (%p3884_p11), [#allocation5], 1024   ;;  %p3885_p8 = pmov %p3884_p11 }
  0x89   : > { %2555 = vsyncadd (%p3885_p8), [#allocation5], 4294966272  ;;  %p3886_p1 = pmov %p3885_p8 }
  0x8b   : > { %2557 = dma.done.wait (%p3886_p1), [#allocation8], 256   ;;  %p3887_p4 = pmov %p3886_p1 }
  0x8c   : > { %s269_s28 = sand.u32 1, %s2656_s21   ;;  %s271_s12 = sand.u32 1, %s2574_s16  }
  0x8d   : > { %2559 = vsyncadd (%p3887_p4), [#allocation8], 4294967040  ;;  %s2842_s13 = sshll.u32 %s271_s12, 4  ;;  %s270_s24 = scalar_lea.sflag [#allocation5], %s269_s28 }
  0x8e   : > { %s273_s15 = scalar_lea.vmem [#allocation9], %s2842_s13  ;;  %p3888_p13 = scmp.ne.s32.totalorder %s3869_s23, 0 }
  0x90   : > { %2561 = dma.done.wait (%p3888_p13), %s270_s24, 512  }
  0x91   : > { %2563 = vsyncadd (%p3888_p13), %s270_s24, 4294966784  ;;  %p311_p5 = scmp.eq.s32.totalorder %s2582_s18, 0  ;;  %s282_s25 = scalar_lea.vmem [#allocation10], %s2842_s13 }
  0x93   : > { %316 = sbr.rel (!%p311_p5) target bundleno = 1319 (0x527), region = 56 }
  0x9a   : > { %v2300_v0 = vld [vmem:[#allocation7] sm:$0xff]   ;;  %v2598_v1 = vmov 0.0   ;;  %v2301_v2 = vld [vmem:[#allocation7 + $0x8] sm:$0xff]   ;;  %vm405_vm0 = vcmask 261120   ;;  %v2306_v7 = vld [vmem:[#allocation4 + $0x10] sm:$0xff]   ;;  %vm625_vm1 = vcmask 64512  }
  0x9b   : > { %317 = vst [vmem:[#allocation3] sm:$0xff] %v2598_v1  ;;  %318 = vst [vmem:[#allocation3 + $0x8] sm:$0xff] %v2598_v1  ;;  %2143 = vmatprep.subr.bf16.mxu0 %v2300_v0  ;;  %2203 = vmatprep.subr.bf16.mxu1 %v2300_v0  ;;  %v2302_v3 = vld [vmem:[#allocation4] sm:$0xff]   ;;  %v2304_v5 = vld [vmem:[#allocation4 + $0x8] sm:$0xff]  }
  0x9c   : > { %319 = vst [vmem:[#allocation3 + $0x10] sm:$0xff] %v2598_v1  ;;  %320 = vst [vmem:[#allocation3 + $0x18] sm:$0xff] %v2598_v1  ;;  %2144 = vmatpush3.bf16.msra.mxu0 %v2300_v0  ;;  %2205 = vmatpush3.bf16.msra.mxu1 %v2300_v0  ;;  %v2303_v4 = vld [vmem:[#allocation4 + $0x20] sm:$0xff]   ;;  %v2305_v6 = vld [vmem:[#allocation4 + $0x28] sm:$0xff]  }
  0x9d   : > { %321 = vst [vmem:[#allocation3 + $0x20] sm:$0xff] %v2598_v1  ;;  %322 = vst [vmem:[#allocation3 + $0x28] sm:$0xff] %v2598_v1  ;;  %2145 = vmatprep.subr.bf16.mxu0 %v2301_v2  ;;  %2204 = vmatprep.subr.bf16.mxu1 %v2301_v2  ;;  %v2308_v8 = vld [vmem:[#allocation4 + $0x30] sm:$0xff]   ;;  %v2307_v9 = vld [vmem:[#allocation4 + $0x18] sm:$0xff]  }
  0x9e   : > { %323 = vst [vmem:[#allocation3 + $0x30] sm:$0xff] %v2598_v1  ;;  %324 = vst [vmem:[#allocation3 + $0x38] sm:$0xff] %v2598_v1  ;;  %2147 = vmatprep.mubr.msk.bf16.mxu0 %vm405_vm0, %v2302_v3  ;;  %2155 = vmatprep.mubr.msk.bf16.mxu1 %vm405_vm0, %v2303_v4  ;;  %v2309_v10 = vld [vmem:[#allocation4 + $0x38] sm:$0xff]  }
  0x9f   : > { %325 = vst [vmem:[#allocation3 + $0x40] sm:$0xff] %v2598_v1  ;;  %326 = vst [vmem:[#allocation3 + $0x48] sm:$0xff] %v2598_v1 }
  0xa0   : > { %327 = vst [vmem:[#allocation3 + $0x50] sm:$0xff] %v2598_v1  ;;  %328 = vst [vmem:[#allocation3 + $0x58] sm:$0xff] %v2598_v1  ;;  %2146 = vmatpush3.bf16.msra.mxu0 %v2301_v2  ;;  %2206 = vmatpush3.bf16.msra.mxu1 %v2301_v2 }
  0xa1   : > { %329 = vst [vmem:[#allocation3 + $0x60] sm:$0xff] %v2598_v1  ;;  %330 = vst [vmem:[#allocation3 + $0x68] sm:$0xff] %v2598_v1 }
  0xa2   : > { %331 = vst [vmem:[#allocation3 + $0x70] sm:$0xff] %v2598_v1  ;;  %332 = vst [vmem:[#allocation3 + $0x78] sm:$0xff] %v2598_v1 }
  0xa3   : > { %2148 = vmatmul.mubr.msk.bf16.vlgmr.msra.gmra.mrb[0].mxu0 %vm405_vm0, %v2304_v5  ;;  %2156 = vmatmul.mubr.msk.bf16.vlgmr.msra.gmra.mrb[0].mxu1 %vm405_vm0, %v2305_v6 }
  0xa4   : > { %2151 = vmatprep.mubr.msk.bf16.mxu0 %vm405_vm0, %v2306_v7  ;;  %2159 = vmatprep.mubr.msk.bf16.mxu1 %vm405_vm0, %v2308_v8 }
  0xab   : > { %2152 = vmatmul.mubr.msk.bf16.gmra.mrb[4].mxu0 %vm405_vm0, %v2307_v9  ;;  %2160 = vmatmul.mubr.msk.bf16.gmra.mrb[4].mxu1 %vm405_vm0, %v2309_v10 }
 0x176   : > { %v2149_v11 = vpop.f32.mrb[0].mxu0  ;;  %v2157_v12 = vpop.f32.mrb[0].mxu1 }
 0x177   : > { %v2062_v13 = vmul.f32 -1.442695, %v2149_v11  ;;  %v2070_v14 = vmul.f32 -1.442695, %v2157_v12  ;;  %v464_v15 = vpop.f32.mrb[1].mxu0  ;;  %v496_v16 = vpop.f32.mrb[1].mxu1 }
 0x178   : > { %v2060_v17 = vmul.f32 -1.442695, %v464_v15  ;;  %v2068_v18 = vmul.f32 -1.442695, %v496_v16  ;;  %v2150_v19 = vpop.f32.mrb[2].mxu0  ;;  %v2158_v20 = vpop.f32.mrb[2].mxu1 }
 0x179   : > { %2310 = vpow2.f32 %v2062_v13  ;;  %v2063_v21 = vmul.f32 -1.442695, %v2150_v19  ;;  %v467_v22 = vpop.f32.mrb[3].mxu0  ;;  %v499_v23 = vpop.f32.mrb[3].mxu1  ;;  %v2071_v24 = vmul.f32 -1.442695, %v2158_v20 }
 0x17a   : > { %2312 = vpow2.f32 %v2070_v14  ;;  %v2061_v25 = vmul.f32 -1.442695, %v467_v22  ;;  %v2069_v26 = vmul.f32 -1.442695, %v499_v23 }
 0x17b   : > { %2314 = vpow2.f32 %v2060_v17 }
 0x17c   : > { %2316 = vpow2.f32 %v2068_v18 }
 0x17d   : > { %2318 = vpow2.f32 %v2063_v21 }
 0x17e   : > { %2320 = vpow2.f32 %v2071_v24  ;;  %v2153_v27 = vpop.f32.mrb[4].mxu0  ;;  %v2161_v28 = vpop.f32.mrb[4].mxu1 }
 0x17f   : > { %2322 = vpow2.f32 %v2061_v25  ;;  %v2066_v29 = vmul.f32 -1.442695, %v2153_v27  ;;  %v480_v30 = vpop.f32.mrb[5].mxu0  ;;  %v512_v31 = vpop.f32.mrb[5].mxu1  ;;  %v2074_v53 = vmul.f32 -1.442695, %v2161_v28 }
 0x180   : > { %2324 = vpow2.f32 %v2069_v26  ;;  %v2154_v32 = vpop.f32.mrb[6].mxu0  ;;  %v2162_v33 = vpop.f32.mrb[6].mxu1  ;;  %v2064_v41 = vmul.f32 -1.442695, %v480_v30  ;;  %v2072_v61 = vmul.f32 -1.442695, %v512_v31 }
 0x181   : > { %2326 = vpow2.f32 %v2066_v29  ;;  %v2067_v34 = vmul.f32 -1.442695, %v2154_v32  ;;  %v483_v35 = vpop.f32.mrb[7].mxu0  ;;  %v515_v36 = vpop.f32.mrb[7].mxu1  ;;  %v2075_v63 = vmul.f32 -1.442695, %v2162_v33 }
 0x182   : > { %v2065_v37 = vmul.f32 -1.442695, %v483_v35  ;;  %v2073_v1 = vmul.f32 -1.442695, %v515_v36 }
 0x183   : > { %v2311_v38 = vpop.eup %2310  ;;  %2328 = vpow2.f32 %v2067_v34 }
 0x184   : > { %v2313_v39 = vpop.eup %2312  ;;  %v577_v40 = vadd.f32 1.0, %v2311_v38  ;;  %2330 = vpow2.f32 %v2065_v37 }
 0x185   : > { %v2315_v42 = vpop.eup %2314  ;;  %v585_v43 = vadd.f32 1.0, %v2313_v39 }
 0x186   : > { %v2317_v44 = vpop.eup %2316  ;;  %2332 = vrcp.f32 %v577_v40  ;;  %v575_v45 = vadd.f32 1.0, %v2315_v42 }
 0x187   : > { %v2319_v46 = vpop.eup %2318  ;;  %2334 = vrcp.f32 %v585_v43  ;;  %v583_v50 = vadd.f32 1.0, %v2317_v44  ;;  %v623_v43 = vlaneseq }
 0x188   : > { %v2321_v47 = vpop.eup %2320  ;;  %v578_v48 = vadd.f32 1.0, %v2319_v46  ;;  %2336 = vpow2.f32 %v2064_v41 }
 0x189   : > { %v2323_v49 = vpop.eup %2322  ;;  %2338 = vrcp.f32 %v575_v45  ;;  %v586_v51 = vadd.f32 1.0, %v2321_v47  ;;  %v2923_v44 = vand.u32 127, %v623_v43 }
 0x18a   : > { %v2325_v52 = vpop.eup %2324  ;;  %2340 = vrcp.f32 %v578_v48  ;;  %v576_v55 = vadd.f32 1.0, %v2323_v49 }
 0x18b   : > { %v2327_v54 = vpop.eup %2326  ;;  %2342 = vrcp.f32 %v586_v51  ;;  %v584_v56 = vadd.f32 1.0, %v2325_v52 }
 0x18c   : > { %2344 = vrcp.f32 %v583_v50  ;;  %v581_v58 = vadd.f32 1.0, %v2327_v54 }
 0x18d   : > { %v2329_v57 = vpop.eup %2328  ;;  %2346 = vpow2.f32 %v2074_v53 }
 0x18e   : > { %v582_v59 = vadd.f32 1.0, %v2329_v57  ;;  %v2331_v60 = vpop.eup %2330  ;;  %2348 = vrcp.f32 %v576_v55 }
 0x18f   : > { %2350 = vrcp.f32 %v584_v56  ;;  %v580_v7 = vadd.f32 1.0, %v2331_v60 }
 0x190   : > { %v2859_v62 = vpop.eup %2332  ;;  %2352 = vrcp.f32 %v581_v58 }
 0x191   : > { %v2861_v0 = vpop.eup %2334  ;;  %v632_v2 = vsel %vm625_vm1, %v2859_v62, -inf  ;;  %2354 = vrcp.f32 %v582_v59 }
 0x192   : > { %v2337_v3 = vpop.eup %2336  ;;  %v656_v4 = vsel %vm625_vm1, %v2861_v0, -inf  ;;  %633 = vmax.xlane.f32.xlu1 %v632_v2  ;;  %2356 = vpow2.f32 %v2072_v61 }
 0x193   : > { %v2867_v5 = vpop.eup %2338  ;;  %657 = vmax.xlane.f32.xlu0 %v656_v4  ;;  %2358 = vpow2.f32 %v2075_v63  ;;  %v579_v8 = vadd.f32 1.0, %v2337_v3 }
 0x194   : > { %v2869_v6 = vpop.eup %2340  ;;  %2360 = vpow2.f32 %v2073_v1  ;;  %v626_v11 = vsel %vm625_vm1, %v2867_v5, -inf }
 0x195   : > { %v635_v9 = vsel %vm625_vm1, %v2869_v6, -inf  ;;  %v2873_v10 = vpop.eup %2342  ;;  %2362 = vrcp.f32 %v580_v7 }
 0x196   : > { %636 = vmax.xlane.f32.xlu1 %v635_v9  ;;  %v2877_v12 = vpop.eup %2344  ;;  %2364 = vrcp.f32 %v579_v8  ;;  %v659_v15 = vsel %vm625_vm1, %v2873_v10, -inf }
 0x197   : > { %627 = vmax.xlane.f32.xlu0 %v626_v11  ;;  %v2347_v13 = vpop.eup %2346  ;;  %v650_v17 = vsel %vm625_vm1, %v2877_v12, -inf }
 0x198   : > { %v2879_v14 = vpop.eup %2348  ;;  %v589_v21 = vadd.f32 1.0, %v2347_v13 }
 0x199   : > { %v2883_v16 = vpop.eup %2350  ;;  %v629_v25 = vsel %vm625_vm1, %v2879_v14, -inf }
 0x19a   : > { %660 = vmax.xlane.f32.xlu1 %v659_v15  ;;  %v2887_v18 = vpop.eup %2352  ;;  %v653_v22 = vsel %vm625_vm1, %v2883_v16, -inf }
 0x19b   : > { %651 = vmax.xlane.f32.xlu0 %v650_v17  ;;  %v2889_v19 = vpop.eup %2354  ;;  %v644_v30 = vsel %vm625_vm1, %v2887_v18, -inf }
 0x19c   : > { %3889 = vst [vmem:[#allocation17_spill] sm:$0xff] %v2889_v19  ;;  %v2357_v20 = vpop.eup %2356  ;;  %v647_v27 = vsel %vm625_vm1, %v2889_v19, -inf }
 0x19d   : > { %v2359_v23 = vpop.eup %2358  ;;  %v587_v24 = vadd.f32 1.0, %v2357_v20 }
 0x19e   : > { %654 = vmax.xlane.f32.xlu1 %v653_v22  ;;  %v2361_v26 = vpop.eup %2360  ;;  %v590_v28 = vadd.f32 1.0, %v2359_v23 }
 0x19f   : > { %630 = vmax.xlane.f32.xlu0 %v629_v25  ;;  %2366 = vrcp.f32 %v587_v24  ;;  %v588_v29 = vadd.f32 1.0, %v2361_v26  ;;  %v2899_v31 = vpop.eup %2362 }
 0x1a0   : > { %2368 = vrcp.f32 %v589_v21  ;;  %3890 = vst [vmem:[#allocation18_spill] sm:$0xff] %v2899_v31  ;;  %v2901_v32 = vpop.eup %2364  ;;  %v641_v33 = vsel %vm625_vm1, %v2899_v31, -inf }
 0x1a1   : > { %2370 = vrcp.f32 %v588_v29  ;;  %v638_v34 = vsel %vm625_vm1, %v2901_v32, -inf }
 0x1a2   : > { %648 = vmax.xlane.f32.xlu1 %v647_v27  ;;  %2372 = vrcp.f32 %v590_v28 }
 0x1a3   : > { %645 = vmax.xlane.f32.xlu0 %v644_v30 }
 0x1a6   : > { %642 = vmax.xlane.f32.xlu1 %v641_v33 }
 0x1a7   : > { %639 = vmax.xlane.f32.xlu0 %v638_v34 }
 0x1a9   : > { %v2907_v35 = vpop.eup %2366 }
 0x1aa   : > { %3891 = vst [vmem:[#allocation19_spill] sm:$0xff] %v2907_v35  ;;  %v2909_v36 = vpop.eup %2368  ;;  %v662_v37 = vsel %vm625_vm1, %v2907_v35, -inf }
 0x1ab   : > { %3892 = vst [vmem:[#allocation20_spill] sm:$0xff] %v2909_v36  ;;  %v2913_v38 = vpop.eup %2370  ;;  %663 = vmax.xlane.f32.xlu0 %v662_v37  ;;  %v668_v41 = vsel %vm625_vm1, %v2909_v36, -inf }
 0x1ac   : > { %3893 = vst [vmem:[#allocation21_spill] sm:$0xff] %v2913_v38  ;;  %v665_v39 = vsel %vm625_vm1, %v2913_v38, -inf  ;;  %v2917_v40 = vpop.eup %2372 }
 0x1ad   : > { %3894 = vst [vmem:[#allocation22_spill] sm:$0xff] %v2917_v40  ;;  %666 = vmax.xlane.f32.xlu1 %v665_v39  ;;  %v671_v42 = vsel %vm625_vm1, %v2917_v40, -inf }
 0x1af   : > { %669 = vmax.xlane.f32.xlu0 %v668_v41 }
 0x1b1   : > { %672 = vmax.xlane.f32.xlu1 %v671_v42 }
 0x21f   : > { %v634_v45 = vpop.xlane.xlu1 %633 }
 0x220   : > { %v658_v46 = vpop.xlane.xlu0 %657  ;;  %vm676_vm2 = vcmp.eq.f32.partialorder %v2859_v62, %v634_v45 }
 0x221   : > { %vm684_vm3 = vcmp.eq.f32.partialorder %v2861_v0, %v658_v46  ;;  %v692_v47 = vsel %vm676_vm2, %v2923_v44, 8 }
 0x222   : > { %v700_v48 = vsel %vm684_vm3, %v2923_v44, 8  ;;  %v2930_v49 = vsel %vm625_vm1, %v692_v47, 2147483647 }
 0x223   : > { %v2933_v50 = vsel %vm625_vm1, %v700_v48, 2147483647  ;;  %v637_v51 = vpop.xlane.xlu1 %636  ;;  %v738_v52 = vshra.s32 %v2930_v49, 16 }
 0x224   : > { %v628_v53 = vpop.xlane.xlu0 %627  ;;  %vm677_vm4 = vcmp.eq.f32.partialorder %v2869_v6, %v637_v51  ;;  %v858_v56 = vshra.s32 %v2933_v50, 16 }
 0x225   : > { %vm674_vm5 = vcmp.eq.f32.partialorder %v2867_v5, %v628_v53  ;;  %v693_v54 = vsel %vm677_vm4, %v2923_v44, 8  ;;  %v2939_v55 = vcvt.s32.f32 %v738_v52 }
 0x226   : > { %v690_v57 = vsel %vm674_vm5, %v2923_v44, 8  ;;  %v2944_v58 = vsel %vm625_vm1, %v693_v54, 2147483647  ;;  %v2955_v3 = vcvt.s32.f32 %v858_v56 }
 0x227   : > { %v2947_v59 = vsel %vm625_vm1, %v690_v57, 2147483647  ;;  %v661_v60 = vpop.xlane.xlu1 %660  ;;  %741 = vmin.xlane.f32.xlu0 %v2939_v55  ;;  %v753_v61 = vshra.s32 %v2944_v58, 16 }
 0x228   : > { %v652_v63 = vpop.xlane.xlu0 %651  ;;  %vm685_vm6 = vcmp.eq.f32.partialorder %v2873_v10, %v661_v60  ;;  %v708_v1 = vshra.s32 %v2947_v59, 16 }
 0x229   : > { %vm682_vm7 = vcmp.eq.f32.partialorder %v2877_v12, %v652_v63  ;;  %v701_v2 = vsel %vm685_vm6, %v2923_v44, 8  ;;  %v2957_v4 = vcvt.s32.f32 %v753_v61 }
 0x22a   : > { %v698_v7 = vsel %vm682_vm7, %v2923_v44, 8  ;;  %v2961_v8 = vsel %vm625_vm1, %v701_v2, 2147483647  ;;  %v2970_v17 = vcvt.s32.f32 %v708_v1 }
 0x22b   : > { %v2964_v9 = vsel %vm625_vm1, %v698_v7, 2147483647  ;;  %v655_v11 = vpop.xlane.xlu1 %654  ;;  %861 = vmin.xlane.f32.xlu0 %v2955_v3  ;;  %756 = vmin.xlane.f32.xlu1 %v2957_v4  ;;  %v873_v13 = vshra.s32 %v2961_v8, 16 }
 0x22c   : > { %vm683_vm8 = vcmp.eq.f32.partialorder %v2883_v16, %v655_v11  ;;  %v631_v15 = vpop.xlane.xlu0 %630  ;;  %v828_v22 = vshra.s32 %v2964_v9, 16 }
 0x22d   : > { %v699_v20 = vsel %vm683_vm8, %v2923_v44, 8  ;;  %vm675_vm9 = vcmp.eq.f32.partialorder %v2879_v14, %v631_v15  ;;  %v2974_v21 = vcvt.s32.f32 %v873_v13 }
 0x22e   : > { %v691_v23 = vsel %vm675_vm9, %v2923_v44, 8  ;;  %v2979_v24 = vsel %vm625_vm1, %v699_v20, 2147483647  ;;  %v2990_v30 = vcvt.s32.f32 %v828_v22 }
 0x22f   : > { %v2982_v25 = vsel %vm625_vm1, %v691_v23, 2147483647  ;;  %711 = vmin.xlane.f32.xlu0 %v2970_v17  ;;  %v649_v26 = vpop.xlane.xlu1 %648  ;;  %876 = vmin.xlane.f32.xlu1 %v2974_v21  ;;  %v843_v37 = vshra.s32 %v2979_v24, 16 }
 0x230   : > { %v646_v27 = vpop.xlane.xlu0 %645  ;;  %vm681_vm10 = vcmp.eq.f32.partialorder %v2889_v19, %v649_v26  ;;  %v723_v28 = vshra.s32 %v2982_v25, 16 }
 0x231   : > { %vm680_vm11 = vcmp.eq.f32.partialorder %v2887_v18, %v646_v27  ;;  %v697_v29 = vsel %vm681_vm10, %v2923_v44, 8  ;;  %v3011_v51 = vcvt.s32.f32 %v843_v37 }
 0x232   : > { %v696_v33 = vsel %vm680_vm11, %v2923_v44, 8  ;;  %v2993_v34 = vcvt.s32.f32 %v723_v28  ;;  %v3000_v41 = vsel %vm625_vm1, %v697_v29, 2147483647 }
 0x233   : > { %v2997_v39 = vsel %vm625_vm1, %v696_v33, 2147483647  ;;  %831 = vmin.xlane.f32.xlu0 %v2990_v30  ;;  %v643_v42 = vpop.xlane.xlu1 %642  ;;  %v813_v52 = vshra.s32 %v3000_v41, 16 }
 0x234   : > { %v640_v43 = vpop.xlane.xlu0 %639  ;;  %726 = vmin.xlane.f32.xlu1 %v2993_v34  ;;  %vm679_vm12 = vcmp.eq.f32.partialorder %v2899_v31, %v643_v42  ;;  %v798_v45 = vshra.s32 %v2997_v39, 16 }
 0x235   : > { %vm678_vm13 = vcmp.eq.f32.partialorder %v2901_v32, %v640_v43  ;;  %v695_v46 = vsel %vm679_vm12, %v2923_v44, 8  ;;  %v3026_v61 = vcvt.s32.f32 %v813_v52  ;;  %v737_v52 = vand.u32 65535, %v2930_v49 }
 0x236   : > { %v694_v47 = vsel %vm678_vm13, %v2923_v44, 8  ;;  %v3009_v48 = vcvt.s32.f32 %v798_v45  ;;  %v3018_v54 = vsel %vm625_vm1, %v695_v46, 2147483647  ;;  %v707_v49 = vand.u32 65535, %v2947_v59 }
 0x237   : > { %v3015_v53 = vsel %vm625_vm1, %v694_v47, 2147483647  ;;  %v783_v63 = vshra.s32 %v3018_v54, 16  ;;  %v827_v59 = vand.u32 65535, %v2964_v9 }
 0x238   : > { %801 = vmin.xlane.f32.xlu0 %v3009_v48  ;;  %846 = vmin.xlane.f32.xlu1 %v3011_v51  ;;  %v768_v56 = vshra.s32 %v3015_v53, 16  ;;  %v664_v57 = vpop.xlane.xlu0 %663 }
 0x239   : > { %vm686_vm14 = vcmp.eq.f32.partialorder %v2907_v35, %v664_v57  ;;  %v3042_v22 = vcvt.s32.f32 %v783_v63  ;;  %v739_v57 = vcvt.s32.f32 %v737_v52  ;;  %v857_v63 = vand.u32 65535, %v2933_v50 }
 0x23a   : > { %v3024_v60 = vcvt.s32.f32 %v768_v56  ;;  %v702_v1 = vsel %vm686_vm14, %v2923_v44, 8  ;;  %v667_v2 = vpop.xlane.xlu1 %666  ;;  %v829_v52 = vcvt.s32.f32 %v827_v59 }
 0x23b   : > { %v3031_v7 = vsel %vm625_vm1, %v702_v1, 2147483647  ;;  %vm687_vm15 = vcmp.eq.f32.partialorder %v2913_v38, %v667_v2  ;;  %v752_v1 = vand.u32 65535, %v2944_v58 }
 0x23c   : > { %771 = vmin.xlane.f32.xlu0 %v3024_v60  ;;  %816 = vmin.xlane.f32.xlu1 %v3026_v61  ;;  %v703_v11 = vsel %vm687_vm15, %v2923_v44, 8  ;;  %v670_v13 = vpop.xlane.xlu0 %669  ;;  %v888_v15 = vshra.s32 %v3031_v7, 16 }
 0x23d   : > { %v3039_v20 = vsel %vm625_vm1, %v703_v11, 2147483647  ;;  %vm688_vm0 = vcmp.eq.f32.partialorder %v2909_v36, %v670_v13 }
 0x23e   : > { %v704_v23 = vsel %vm688_vm0, %v2923_v44, 8  ;;  %v673_v26 = vpop.xlane.xlu1 %672  ;;  %v3045_v27 = vcvt.s32.f32 %v888_v15  ;;  %v903_v28 = vshra.s32 %v3039_v20, 16  ;;  %v859_v15 = vcvt.s32.f32 %v857_v63 }
 0x23f   : > { %v3049_v29 = vsel %vm625_vm1, %v704_v23, 2147483647  ;;  %vm689_vm2 = vcmp.eq.f32.partialorder %v2917_v40, %v673_v26  ;;  %v754_v23 = vcvt.s32.f32 %v752_v1  ;;  %v872_v26 = vand.u32 65535, %v2961_v8 }
 0x240   : > { %786 = vmin.xlane.f32.xlu1 %v3042_v22  ;;  %v705_v33 = vsel %vm689_vm2, %v2923_v44, 8  ;;  %891 = vmin.xlane.f32.xlu0 %v3045_v27  ;;  %v918_v37 = vshra.s32 %v3049_v29, 16  ;;  %v3059_v43 = vcvt.s32.f32 %v903_v28  ;;  %v842_v63 = vand.u32 65535, %v2979_v24 }
 0x241   : > { %v3057_v42 = vsel %vm625_vm1, %v705_v33, 2147483647  ;;  %v709_v33 = vcvt.s32.f32 %v707_v49  ;;  %v812_v49 = vand.u32 65535, %v3000_v41  ;;  %v887_v41 = vand.u32 65535, %v3031_v7 }
 0x242   : > { %v3061_v45 = vcvt.s32.f32 %v918_v37  ;;  %v933_v46 = vshra.s32 %v3057_v42, 16  ;;  %v874_v37 = vcvt.s32.f32 %v872_v26  ;;  %v902_v59 = vand.u32 65535, %v3039_v20 }
 0x243   : > { %v932_v20 = vand.u32 65535, %v3057_v42 }
 0x244   : > { %906 = vmin.xlane.f32.xlu1 %v3059_v43  ;;  %921 = vmin.xlane.f32.xlu0 %v3061_v45  ;;  %v3066_v47 = vcvt.s32.f32 %v933_v46 }
 0x248   : > { %936 = vmin.xlane.f32.xlu1 %v3066_v47 }
 0x2b4   : > { %v3070_v56 = vpop.xlane.xlu0 %741 }
 0x2b5   : > { %vm743_vm3 = vcmp.eq.f32.partialorder %v2939_v55, %v3070_v56 }
 0x2b6   : > { %v744_v2 = vsel %vm743_vm3, %v739_v57, inf }
 0x2b7   : > { %745 = vmin.xlane.f32.xlu0 %v744_v2 }
 0x2b8   : > { %v3076_v11 = vpop.xlane.xlu0 %861  ;;  %v3078_v13 = vpop.xlane.xlu1 %756 }
 0x2b9   : > { %vm863_vm4 = vcmp.eq.f32.partialorder %v2955_v3, %v3076_v11  ;;  %vm758_vm5 = vcmp.eq.f32.partialorder %v2957_v4, %v3078_v13  ;;  %v722_v3 = vand.u32 65535, %v2982_v25 }
 0x2ba   : > { %v864_v50 = vsel %vm863_vm4, %v859_v15, inf  ;;  %v759_v55 = vsel %vm758_vm5, %v754_v23, inf  ;;  %v844_v23 = vcvt.s32.f32 %v842_v63  ;;  %v748_v63 = vcvt.f32.s32 %v3070_v56 }
 0x2bb   : > { %865 = vmin.xlane.f32.xlu0 %v864_v50  ;;  %760 = vmin.xlane.f32.xlu1 %v759_v55  ;;  %v724_v9 = vcvt.s32.f32 %v722_v3  ;;  %v814_v55 = vcvt.s32.f32 %v812_v49 }
 0x2bc   : > { %v3086_v58 = vpop.xlane.xlu0 %711  ;;  %v3088_v28 = vpop.xlane.xlu1 %876 }
 0x2bd   : > { %vm713_vm6 = vcmp.eq.f32.partialorder %v2970_v17, %v3086_v58  ;;  %vm878_vm7 = vcmp.eq.f32.partialorder %v2974_v21, %v3088_v28  ;;  %v797_v17 = vand.u32 65535, %v2997_v39  ;;  %v718_v49 = vcvt.f32.s32 %v3086_v58 }
 0x2be   : > { %v714_v4 = vsel %vm713_vm6, %v709_v33, inf  ;;  %v879_v8 = vsel %vm878_vm7, %v874_v37, inf }
 0x2bf   : > { %715 = vmin.xlane.f32.xlu0 %v714_v4  ;;  %880 = vmin.xlane.f32.xlu1 %v879_v8  ;;  %v799_v15 = vcvt.s32.f32 %v797_v17  ;;  %v904_v8 = vcvt.s32.f32 %v902_v59  ;;  %v934_v17 = vcvt.s32.f32 %v932_v20 }
 0x2c0   : > { %v3096_v46 = vpop.xlane.xlu0 %831 }
 0x2c1   : > { %v3098_v57 = vpop.xlane.xlu1 %726  ;;  %vm833_vm8 = vcmp.eq.f32.partialorder %v2990_v30, %v3096_v46  ;;  %v767_v30 = vand.u32 65535, %v3015_v53  ;;  %v782_v53 = vand.u32 65535, %v3018_v54  ;;  %v889_v54 = vcvt.s32.f32 %v887_v41 }
 0x2c2   : > { %v834_v21 = vsel %vm833_vm8, %v829_v52, inf  ;;  %vm728_vm9 = vcmp.eq.f32.partialorder %v2993_v34, %v3098_v57 }
 0x2c3   : > { %835 = vmin.xlane.f32.xlu0 %v834_v21  ;;  %v729_v25 = vsel %vm728_vm9, %v724_v9, inf  ;;  %v769_v50 = vcvt.s32.f32 %v767_v30  ;;  %v784_v37 = vcvt.s32.f32 %v782_v53  ;;  %v868_v21 = vcvt.f32.s32 %v3076_v11 }
 0x2c4   : > { %730 = vmin.xlane.f32.xlu1 %v729_v25  ;;  %v749_v25 = vshll.u32 %v748_v63, 16 }
 0x2c5   : > { %v3106_v1 = vpop.xlane.xlu0 %801  ;;  %v3108_v2 = vpop.xlane.xlu1 %846  ;;  %v869_v30 = vshll.u32 %v868_v21, 16 }
 0x2c6   : > { %vm803_vm10 = vcmp.eq.f32.partialorder %v3009_v48, %v3106_v1  ;;  %vm848_vm11 = vcmp.eq.f32.partialorder %v3011_v51, %v3108_v2  ;;  %v853_v21 = vcvt.f32.s32 %v3108_v2 }
 0x2c7   : > { %v804_v24 = vsel %vm803_vm10, %v799_v15, inf  ;;  %v849_v34 = vsel %vm848_vm11, %v844_v23, inf }
 0x2c8   : > { %805 = vmin.xlane.f32.xlu0 %v804_v24  ;;  %850 = vmin.xlane.f32.xlu1 %v849_v34  ;;  %v883_v24 = vcvt.f32.s32 %v3088_v28  ;;  %v719_v28 = vshll.u32 %v718_v49, 16 }
 0x2c9   : > { %v3116_v39 = vpop.xlane.xlu0 %771  ;;  %v3118_v26 = vpop.xlane.xlu1 %816 }
 0x2ca   : > { %vm773_vm12 = vcmp.eq.f32.partialorder %v3024_v60, %v3116_v39  ;;  %vm818_vm13 = vcmp.eq.f32.partialorder %v3026_v61, %v3118_v26  ;;  %v917_v60 = vand.u32 65535, %v3049_v29  ;;  %v884_v41 = vshll.u32 %v883_v24, 16 }
 0x2cb   : > { %v774_v48 = vsel %vm773_vm12, %v769_v50, inf  ;;  %v819_v51 = vsel %vm818_vm13, %v814_v55, inf }
 0x2cc   : > { %775 = vmin.xlane.f32.xlu0 %v774_v48  ;;  %820 = vmin.xlane.f32.xlu1 %v819_v51  ;;  %v919_v9 = vcvt.s32.f32 %v917_v60  ;;  %v838_v48 = vcvt.f32.s32 %v3096_v46  ;;  %v733_v51 = vcvt.f32.s32 %v3098_v57 }
 0x2cd   : > { %v3126_v33 = vpop.xlane.xlu1 %786  ;;  %v3129_v3 = vpop.xlane.xlu0 %891 }
 0x2ce   : > { %vm788_vm14 = vcmp.eq.f32.partialorder %v3042_v22, %v3126_v33  ;;  %vm893_vm15 = vcmp.eq.f32.partialorder %v3045_v27, %v3129_v3 }
 0x2cf   : > { %v789_v61 = vsel %vm788_vm14, %v784_v37, inf  ;;  %v894_v7 = vsel %vm893_vm15, %v889_v54, inf }
 0x2d0   : > { %790 = vmin.xlane.f32.xlu1 %v789_v61  ;;  %895 = vmin.xlane.f32.xlu0 %v894_v7 }
 0x2d1   : > { %v3136_v4 = vpop.xlane.xlu1 %906  ;;  %v3139_v52 = vpop.xlane.xlu0 %921 }
 0x2d2   : > { %vm908_vm0 = vcmp.eq.f32.partialorder %v3059_v43, %v3136_v4  ;;  %vm923_vm2 = vcmp.eq.f32.partialorder %v3061_v45, %v3139_v52  ;;  %v763_v45 = vcvt.f32.s32 %v3078_v13 }
 0x2d3   : > { %v909_v22 = vsel %vm908_vm0, %v904_v8, inf  ;;  %v924_v27 = vsel %vm923_vm2, %v919_v9, inf  ;;  %v839_v9 = vshll.u32 %v838_v48, 16 }
 0x2d4   : > { %910 = vmin.xlane.f32.xlu1 %v909_v22  ;;  %925 = vmin.xlane.f32.xlu0 %v924_v27  ;;  %v764_v50 = vshll.u32 %v763_v45, 16  ;;  %v734_v22 = vshll.u32 %v733_v51, 16 }
 0x2d5   : > { %v3145_v29 = vpop.xlane.xlu1 %936 }
 0x2d6   : > { %vm938_vm3 = vcmp.eq.f32.partialorder %v3066_v47, %v3145_v29 }
 0x2d7   : > { %v939_v42 = vsel %vm938_vm3, %v934_v17, inf  ;;  %v808_v17 = vcvt.f32.s32 %v3106_v1 }
 0x2d8   : > { %940 = vmin.xlane.f32.xlu1 %v939_v42 }
 0x2d9   : > { %v809_v24 = vshll.u32 %v808_v17, 16 }
 0x344   : > { %v746_v43 = vpop.xlane.xlu0 %745 }
 0x345   : > { %v747_v15 = vcvt.f32.s32 %v746_v43 }
 0x347   : > { %v3152_v23 = vadd.s32 %v749_v25, %v747_v15 }
 0x348   : > { %v866_v34 = vpop.xlane.xlu0 %865  ;;  %v761_v47 = vpop.xlane.xlu1 %760 }
 0x349   : > { %v867_v55 = vcvt.f32.s32 %v866_v34  ;;  %v762_v53 = vcvt.f32.s32 %v761_v47  ;;  %vm948_vm4 = vcmp.eq.s32.totalorder %v2923_v44, %v3152_v23  ;;  %v823_v34 = vcvt.f32.s32 %v3118_v26 }
 0x34a   : > { %v3162_v56 = vsel %vm948_vm4, -inf, %v2859_v62 }
 0x34b   : > { %v3164_v11 = vadd.s32 %v869_v30, %v867_v55  ;;  %v3166_v13 = vadd.s32 %v764_v50, %v762_v53  ;;  %v1000_v58 = vsel %vm625_vm1, %v3162_v56, -inf  ;;  %v778_v30 = vcvt.f32.s32 %v3116_v39 }
 0x34c   : > { %1001 = vmax.xlane.f32.xlu0 %v1000_v58  ;;  %v716_v37 = vpop.xlane.xlu0 %715  ;;  %v881_v59 = vpop.xlane.xlu1 %880  ;;  %v854_v55 = vshll.u32 %v853_v21, 16 }
 0x34d   : > { %v717_v54 = vcvt.f32.s32 %v716_v37  ;;  %v882_v60 = vcvt.f32.s32 %v881_v59  ;;  %vm956_vm5 = vcmp.eq.s32.totalorder %v2923_v44, %v3164_v11  ;;  %vm949_vm6 = vcmp.eq.s32.totalorder %v2923_v44, %v3166_v13 }
 0x34e   : > { %v3180_v61 = vsel %vm956_vm5, -inf, %v2861_v0  ;;  %v3186_v46 = vsel %vm949_vm6, -inf, %v2869_v6  ;;  %v779_v26 = vshll.u32 %v778_v30, 16  ;;  %v824_v37 = vshll.u32 %v823_v34, 16 }
 0x34f   : > { %v3188_v57 = vadd.s32 %v719_v28, %v717_v54  ;;  %v3190_v7 = vadd.s32 %v884_v41, %v882_v60  ;;  %v1024_v8 = vsel %vm625_vm1, %v3180_v61, -inf  ;;  %v1003_v20 = vsel %vm625_vm1, %v3186_v46, -inf }
 0x350   : > { %1025 = vmax.xlane.f32.xlu0 %v1024_v8  ;;  %v836_v27 = vpop.xlane.xlu0 %835  ;;  %1004 = vmax.xlane.f32.xlu1 %v1003_v20  ;;  %v898_v59 = vcvt.f32.s32 %v3129_v3  ;;  %v793_v54 = vcvt.f32.s32 %v3126_v33  ;;  %v928_v34 = vcvt.f32.s32 %v3139_v52  ;;  %v972_v23 = vsel %vm956_vm5, %v2861_v0, 0.0 }
 0x351   : > { %v837_v42 = vcvt.f32.s32 %v836_v27  ;;  %v731_v63 = vpop.xlane.xlu1 %730  ;;  %vm946_vm7 = vcmp.eq.s32.totalorder %v2923_v44, %v3188_v57  ;;  %vm957_vm8 = vcmp.eq.s32.totalorder %v2923_v44, %v3190_v7 }
 0x352   : > { %v732_v43 = vcvt.f32.s32 %v731_v63  ;;  %v3206_v25 = vsel %vm946_vm7, -inf, %v2867_v5  ;;  %v3212_v1 = vsel %vm957_vm8, -inf, %v2873_v10  ;;  %v899_v21 = vshll.u32 %v898_v59, 16 }
 0x353   : > { %v3214_v45 = vadd.s32 %v839_v9, %v837_v42  ;;  %v994_v15 = vsel %vm625_vm1, %v3206_v25, -inf  ;;  %v1027_v2 = vsel %vm625_vm1, %v3212_v1, -inf }
 0x354   : > { %v3221_v49 = vadd.s32 %v734_v22, %v732_v43  ;;  %995 = vmax.xlane.f32.xlu0 %v994_v15  ;;  %1028 = vmax.xlane.f32.xlu1 %v1027_v2  ;;  %v794_v43 = vshll.u32 %v793_v54, 16  ;;  %v913_v2 = vcvt.f32.s32 %v3136_v4 }
 0x355   : > { %v806_v47 = vpop.xlane.xlu0 %805  ;;  %v851_v50 = vpop.xlane.xlu1 %850  ;;  %vm954_vm9 = vcmp.eq.s32.totalorder %v2923_v44, %v3214_v45 }
 0x356   : > { %v807_v53 = vcvt.f32.s32 %v806_v47  ;;  %v852_v58 = vcvt.f32.s32 %v851_v50  ;;  %v3230_v39 = vsel %vm954_vm9, -inf, %v2877_v12  ;;  %vm947_vm10 = vcmp.eq.s32.totalorder %v2923_v44, %v3221_v49 }
 0x357   : > { %v1018_v28 = vsel %vm625_vm1, %v3230_v39, -inf  ;;  %v3244_v51 = vsel %vm947_vm10, -inf, %v2879_v14 }
 0x358   : > { %v3236_v41 = vadd.s32 %v809_v24, %v807_v53  ;;  %v3238_v48 = vadd.s32 %v854_v55, %v852_v58  ;;  %1019 = vmax.xlane.f32.xlu0 %v1018_v28  ;;  %v997_v8 = vsel %vm625_vm1, %v3244_v51, -inf }
 0x359   : > { %v776_v60 = vpop.xlane.xlu0 %775  ;;  %v821_v20 = vpop.xlane.xlu1 %820  ;;  %998 = vmax.xlane.f32.xlu1 %v997_v8 }
 0x35a   : > { %v777_v9 = vcvt.f32.s32 %v776_v60  ;;  %v822_v22 = vcvt.f32.s32 %v821_v20  ;;  %vm952_vm11 = vcmp.eq.s32.totalorder %v2923_v44, %v3236_v41  ;;  %vm955_vm12 = vcmp.eq.s32.totalorder %v2923_v44, %v3238_v48 }
 0x35b   : > { %v3258_v3 = vsel %vm952_vm11, -inf, %v2887_v18  ;;  %v3264_v33 = vsel %vm955_vm12, -inf, %v2883_v16  ;;  %v929_v60 = vshll.u32 %v928_v34, 16 }
 0x35c   : > { %v3266_v27 = vadd.s32 %v779_v26, %v777_v9  ;;  %v3268_v17 = vadd.s32 %v824_v37, %v822_v22  ;;  %v1012_v42 = vsel %vm625_vm1, %v3258_v3, -inf  ;;  %v1021_v63 = vsel %vm625_vm1, %v3264_v33, -inf }
 0x35d   : > { %1013 = vmax.xlane.f32.xlu0 %v1012_v42  ;;  %v791_v15 = vpop.xlane.xlu1 %790  ;;  %v896_v30 = vpop.xlane.xlu0 %895  ;;  %1022 = vmax.xlane.f32.xlu1 %v1021_v63  ;;  %v914_v26 = vshll.u32 %v913_v2, 16  ;;  %v943_v37 = vcvt.f32.s32 %v3145_v29 }
 0x35e   : > { %3895 = vst [vmem:[#allocation23_spill] sm:$0xff] %v3268_v17  ;;  %v792_v24 = vcvt.f32.s32 %v791_v15  ;;  %vm950_vm13 = vcmp.eq.s32.totalorder %v2923_v44, %v3266_v27  ;;  %vm953_vm14 = vcmp.eq.s32.totalorder %v2923_v44, %v3268_v17  ;;  %v897_v47 = vcvt.f32.s32 %v896_v30 }
 0x35f   : > { %v3284_v50 = vsel %vm950_vm13, -inf, %v2901_v32  ;;  %v3290_v4 = vsel %vm953_vm14, -inf, %v2889_v19 }
 0x360   : > { %v3292_v55 = vadd.s32 %v794_v43, %v792_v24  ;;  %v1006_v53 = vsel %vm625_vm1, %v3284_v50, -inf  ;;  %v1015_v52 = vsel %vm625_vm1, %v3290_v4, -inf  ;;  %v3298_v58 = vadd.s32 %v899_v21, %v897_v47 }
 0x361   : > { %1007 = vmax.xlane.f32.xlu0 %v1006_v53  ;;  %v911_v28 = vpop.xlane.xlu1 %910  ;;  %v926_v59 = vpop.xlane.xlu0 %925  ;;  %1016 = vmax.xlane.f32.xlu1 %v1015_v52  ;;  %v944_v43 = vshll.u32 %v943_v37, 16 }
 0x362   : > { %3896 = vst [vmem:[#allocation24_spill] sm:$0xff] %v3292_v55  ;;  %3897 = vst [vmem:[#allocation25_spill] sm:$0xff] %v3298_v58  ;;  %v912_v54 = vcvt.f32.s32 %v911_v28  ;;  %vm3866_vm15 = vcmp.eq.s32.totalorder %v2923_v44, %v3292_v55  ;;  %v927_v8 = vcvt.f32.s32 %v926_v59  ;;  %vm3846_vm0 = vcmp.eq.s32.totalorder %v2923_v44, %v3298_v58 }
 0x363   : > { %v3309_v20 = vsel %vm3866_vm15, -inf, %v2899_v31  ;;  %v3317_v29 = vsel %vm3846_vm0, -inf, %v2907_v35 }
 0x364   : > { %v3311_v9 = vadd.s32 %v914_v26, %v912_v54  ;;  %v1009_v22 = vsel %vm625_vm1, %v3309_v20, -inf  ;;  %v3321_v42 = vadd.s32 %v929_v60, %v927_v8  ;;  %v1030_v63 = vsel %vm625_vm1, %v3317_v29, -inf }
 0x365   : > { %v941_v21 = vpop.xlane.xlu1 %940  ;;  %1031 = vmax.xlane.f32.xlu0 %v1030_v63  ;;  %1010 = vmax.xlane.f32.xlu1 %v1009_v22 }
 0x366   : > { %3898 = vst [vmem:[#allocation26_spill] sm:$0xff] %v3311_v9  ;;  %3899 = vst [vmem:[#allocation27_spill] sm:$0xff] %v3321_v42  ;;  %v942_v15 = vcvt.f32.s32 %v941_v21  ;;  %vm3844_vm2 = vcmp.eq.s32.totalorder %v2923_v44, %v3311_v9  ;;  %vm3845_vm3 = vcmp.eq.s32.totalorder %v2923_v44, %v3321_v42 }
 0x367   : > { %v3333_v2 = vsel %vm3844_vm2, -inf, %v2913_v38  ;;  %v3341_v24 = vsel %vm3845_vm3, -inf, %v2909_v36 }
 0x368   : > { %v3335_v30 = vadd.s32 %v944_v43, %v942_v15  ;;  %v1033_v34 = vsel %vm625_vm1, %v3333_v2, -inf  ;;  %v1036_v47 = vsel %vm625_vm1, %v3341_v24, -inf }
 0x369   : > { %1037 = vmax.xlane.f32.xlu0 %v1036_v47  ;;  %1034 = vmax.xlane.f32.xlu1 %v1033_v34 }
 0x36a   : > { %3900 = vst [vmem:[#allocation28_spill] sm:$0xff] %v3335_v30  ;;  %vm3847_vm2 = vcmp.eq.s32.totalorder %v2923_v44, %v3335_v30 }
 0x36b   : > { %v3353_v53 = vsel %vm3847_vm2, -inf, %v2917_v40 }
 0x36c   : > { %v1039_v52 = vsel %vm625_vm1, %v3353_v53, -inf }
 0x36d   : > { %1040 = vmax.xlane.f32.xlu1 %v1039_v52 }
 0x3d9   : > { %v1002_v28 = vpop.xlane.xlu0 %1001 }
 0x3da   : > { %vm1044_vm3 = vcmp.eq.f32.partialorder %v3162_v56, %v1002_v28 }
 0x3db   : > { %v1060_v26 = vsel %vm1044_vm3, %v2923_v44, 8 }
 0x3dc   : > { %v3360_v37 = vsel %vm625_vm1, %v1060_v26, 2147483647 }
 0x3dd   : > { %v1026_v59 = vpop.xlane.xlu0 %1025  ;;  %v1005_v54 = vpop.xlane.xlu1 %1004  ;;  %v1106_v60 = vshra.s32 %v3360_v37, 16 }
 0x3de   : > { %vm1052_vm0 = vcmp.eq.f32.partialorder %v3180_v61, %v1026_v59  ;;  %vm1045_vm2 = vcmp.eq.f32.partialorder %v3186_v46, %v1005_v54 }
 0x3df   : > { %v1068_v8 = vsel %vm1052_vm0, %v2923_v44, 8  ;;  %v1061_v22 = vsel %vm1045_vm2, %v2923_v44, 8  ;;  %v3367_v63 = vcvt.s32.f32 %v1106_v60 }
 0x3e0   : > { %v3370_v56 = vsel %vm625_vm1, %v1068_v8, 2147483647  ;;  %v3373_v21 = vsel %vm625_vm1, %v1061_v22, 2147483647 }
 0x3e1   : > { %1109 = vmin.xlane.f32.xlu0 %v3367_v63  ;;  %v996_v43 = vpop.xlane.xlu0 %995  ;;  %v1029_v15 = vpop.xlane.xlu1 %1028  ;;  %v1226_v61 = vshra.s32 %v3370_v56, 16  ;;  %v1121_v46 = vshra.s32 %v3373_v21, 16 }
 0x3e2   : > { %vm1042_vm0 = vcmp.eq.f32.partialorder %v3206_v25, %v996_v43  ;;  %vm1053_vm2 = vcmp.eq.f32.partialorder %v3212_v1, %v1029_v15 }
 0x3e3   : > { %v1058_v34 = vsel %vm1042_vm0, %v2923_v44, 8  ;;  %v1069_v47 = vsel %vm1053_vm2, %v2923_v44, 8  ;;  %v3382_v52 = vcvt.s32.f32 %v1226_v61  ;;  %v3384_v28 = vcvt.s32.f32 %v1121_v46 }
 0x3e4   : > { %v3387_v26 = vsel %vm625_vm1, %v1058_v34, 2147483647  ;;  %v3390_v59 = vsel %vm625_vm1, %v1069_v47, 2147483647 }
 0x3e5   : > { %1229 = vmin.xlane.f32.xlu0 %v3382_v52  ;;  %v1020_v54 = vpop.xlane.xlu0 %1019  ;;  %1124 = vmin.xlane.f32.xlu1 %v3384_v28  ;;  %v1076_v25 = vshra.s32 %v3387_v26, 16  ;;  %v1241_v1 = vshra.s32 %v3390_v59, 16  ;;  %v1240_v19 = vand.u32 65535, %v3390_v59 }
 0x3e6   : > { %vm1050_vm3 = vcmp.eq.f32.partialorder %v3230_v39, %v1020_v54  ;;  %v999_v8 = vpop.xlane.xlu1 %998 }
 0x3e7   : > { %v1066_v60 = vsel %vm1050_vm3, %v2923_v44, 8  ;;  %v3398_v22 = vcvt.s32.f32 %v1076_v25  ;;  %v3400_v43 = vcvt.s32.f32 %v1241_v1  ;;  %vm1043_vm0 = vcmp.eq.f32.partialorder %v3244_v51, %v999_v8 }
 0x3e8   : > { %v3403_v15 = vsel %vm625_vm1, %v1066_v60, 2147483647  ;;  %v1059_v61 = vsel %vm1043_vm0, %v2923_v44, 8 }
 0x3e9   : > { %1079 = vmin.xlane.f32.xlu0 %v3398_v22  ;;  %1244 = vmin.xlane.f32.xlu1 %v3400_v43  ;;  %v1196_v39 = vshra.s32 %v3403_v15, 16  ;;  %v3411_v46 = vsel %vm625_vm1, %v1059_v61, 2147483647 }
 0x3ea   : > { %v1014_v34 = vpop.xlane.xlu0 %1013  ;;  %v1023_v47 = vpop.xlane.xlu1 %1022  ;;  %v1091_v25 = vshra.s32 %v3411_v46, 16 }
 0x3eb   : > { %vm1048_vm2 = vcmp.eq.f32.partialorder %v3258_v3, %v1014_v34  ;;  %v3414_v54 = vcvt.s32.f32 %v1196_v39  ;;  %vm1051_vm3 = vcmp.eq.f32.partialorder %v3264_v33, %v1023_v47 }
 0x3ec   : > { %v1064_v51 = vsel %vm1048_vm2, %v2923_v44, 8  ;;  %v1067_v60 = vsel %vm1051_vm3, %v2923_v44, 8  ;;  %v3424_v8 = vcvt.s32.f32 %v1091_v25 }
 0x3ed   : > { %v3420_v1 = vsel %vm625_vm1, %v1064_v51, 2147483647  ;;  %1199 = vmin.xlane.f32.xlu0 %v3414_v54  ;;  %v3427_v3 = vsel %vm625_vm1, %v1067_v60, 2147483647 }
 0x3ee   : > { %v1008_v61 = vpop.xlane.xlu0 %1007  ;;  %v1166_v39 = vshra.s32 %v3420_v1, 16  ;;  %1094 = vmin.xlane.f32.xlu1 %v3424_v8  ;;  %v1017_v33 = vpop.xlane.xlu1 %1016  ;;  %v1211_v34 = vshra.s32 %v3427_v3, 16 }
 0x3ef   : > { %vm1046_vm0 = vcmp.eq.f32.partialorder %v3284_v50, %v1008_v61  ;;  %vm1049_vm2 = vcmp.eq.f32.partialorder %v3290_v4, %v1017_v33 }
 0x3f0   : > { %v1062_v47 = vsel %vm1046_vm0, %v2923_v44, 8  ;;  %v3435_v51 = vcvt.s32.f32 %v1166_v39  ;;  %v1065_v60 = vsel %vm1049_vm2, %v2923_v44, 8  ;;  %v3441_v30 = vcvt.s32.f32 %v1211_v34 }
 0x3f1   : > { %v3438_v25 = vsel %vm625_vm1, %v1062_v47, 2147483647  ;;  %v3444_v50 = vsel %vm625_vm1, %v1065_v60, 2147483647 }
 0x3f2   : > { %1169 = vmin.xlane.f32.xlu0 %v3435_v51  ;;  %v1136_v61 = vshra.s32 %v3438_v25, 16  ;;  %v1032_v40 = vpop.xlane.xlu0 %1031  ;;  %1214 = vmin.xlane.f32.xlu1 %v3441_v30  ;;  %v1011_v4 = vpop.xlane.xlu1 %1010  ;;  %v1181_v39 = vshra.s32 %v3444_v50, 16 }
 0x3f3   : > { %vm1054_vm3 = vcmp.eq.f32.partialorder %v3317_v29, %v1032_v40  ;;  %vm1047_vm0 = vcmp.eq.f32.partialorder %v3309_v20, %v1011_v4 }
 0x3f4   : > { %v3452_v33 = vcvt.s32.f32 %v1136_v61  ;;  %v1070_v34 = vsel %vm1054_vm3, %v2923_v44, 8  ;;  %v1063_v47 = vsel %vm1047_vm0, %v2923_v44, 8  ;;  %v3456_v60 = vcvt.s32.f32 %v1181_v39 }
 0x3f5   : > { %v3459_v9 = vsel %vm625_vm1, %v1070_v34, 2147483647  ;;  %v3462_v38 = vsel %vm625_vm1, %v1063_v47, 2147483647 }
 0x3f6   : > { %1139 = vmin.xlane.f32.xlu0 %v3452_v33  ;;  %v1038_v42 = vpop.xlane.xlu0 %1037  ;;  %1184 = vmin.xlane.f32.xlu1 %v3456_v60  ;;  %v1035_v40 = vpop.xlane.xlu1 %1034  ;;  %v1256_v20 = vshra.s32 %v3459_v9, 16  ;;  %v1151_v29 = vshra.s32 %v3462_v38, 16 }
 0x3f7   : > { %vm1056_vm2 = vcmp.eq.f32.partialorder %v3341_v24, %v1038_v42  ;;  %vm1055_vm3 = vcmp.eq.f32.partialorder %v3333_v2, %v1035_v40 }
 0x3f8   : > { %v1072_v61 = vsel %vm1056_vm2, %v2923_v44, 8  ;;  %v1071_v4 = vsel %vm1055_vm3, %v2923_v44, 8  ;;  %v3472_v39 = vcvt.s32.f32 %v1256_v20  ;;  %v3474_v34 = vcvt.s32.f32 %v1151_v29 }
 0x3f9   : > { %v3477_v47 = vsel %vm625_vm1, %v1072_v61, 2147483647  ;;  %v3480_v36 = vsel %vm625_vm1, %v1071_v4, 2147483647 }
 0x3fa   : > { %1259 = vmin.xlane.f32.xlu0 %v3472_v39  ;;  %1154 = vmin.xlane.f32.xlu1 %v3474_v34  ;;  %v1041_v42 = vpop.xlane.xlu1 %1040  ;;  %v1286_v2 = vshra.s32 %v3477_v47, 16  ;;  %v1271_v24 = vshra.s32 %v3480_v36, 16 }
 0x3fb   : > { %vm1057_vm0 = vcmp.eq.f32.partialorder %v3353_v53, %v1041_v42  ;;  %v1105_v53 = vand.u32 65535, %v3360_v37  ;;  %v1075_v37 = vand.u32 65535, %v3387_v26  ;;  %v1195_v26 = vand.u32 65535, %v3403_v15 }
 0x3fc   : > { %v1073_v40 = vsel %vm1057_vm0, %v2923_v44, 8  ;;  %v3488_v20 = vcvt.s32.f32 %v1286_v2  ;;  %v3490_v29 = vcvt.s32.f32 %v1271_v24  ;;  %v1225_v24 = vand.u32 65535, %v3370_v56 }
 0x3fd   : > { %v3493_v61 = vsel %vm625_vm1, %v1073_v40, 2147483647  ;;  %v1107_v2 = vcvt.s32.f32 %v1105_v53  ;;  %v1120_v40 = vand.u32 65535, %v3373_v21  ;;  %v1077_v53 = vcvt.s32.f32 %v1075_v37 }
 0x3fe   : > { %1289 = vmin.xlane.f32.xlu0 %v3488_v20  ;;  %1274 = vmin.xlane.f32.xlu1 %v3490_v29  ;;  %v1301_v4 = vshra.s32 %v3493_v61, 16  ;;  %v1227_v31 = vcvt.s32.f32 %v1225_v24  ;;  %v1197_v59 = vcvt.s32.f32 %v1195_v26 }
 0x3ff   : > { %v1122_v17 = vcvt.s32.f32 %v1120_v40 }
 0x400   : > { %v3498_v58 = vcvt.s32.f32 %v1301_v4 }
 0x402   : > { %1304 = vmin.xlane.f32.xlu1 %v3498_v58 }
 0x46e   : > { %v3502_v42 = vpop.xlane.xlu0 %1109 }
 0x46f   : > { %vm1111_vm2 = vcmp.eq.f32.partialorder %v3367_v63, %v3502_v42 }
 0x470   : > { %v1112_v35 = vsel %vm1111_vm2, %v1107_v2, inf  ;;  %v1242_v2 = vcvt.s32.f32 %v1240_v19  ;;  %v1165_v19 = vand.u32 65535, %v3420_v1 }
 0x471   : > { %1113 = vmin.xlane.f32.xlu0 %v1112_v35 }
 0x472   : > { %v3508_v55 = vpop.xlane.xlu0 %1229  ;;  %v3510_v4 = vpop.xlane.xlu1 %1124  ;;  %v1167_v37 = vcvt.s32.f32 %v1165_v19 }
 0x473   : > { %vm1231_vm3 = vcmp.eq.f32.partialorder %v3382_v52, %v3508_v55  ;;  %vm1126_vm0 = vcmp.eq.f32.partialorder %v3384_v28, %v3510_v4 }
 0x474   : > { %v1232_v56 = vsel %vm1231_vm3, %v1227_v31, inf  ;;  %v1127_v63 = vsel %vm1126_vm0, %v1122_v17, inf  ;;  %v1090_v31 = vand.u32 65535, %v3411_v46 }
 0x475   : > { %1233 = vmin.xlane.f32.xlu0 %v1232_v56  ;;  %1128 = vmin.xlane.f32.xlu1 %v1127_v63  ;;  %v1135_v56 = vand.u32 65535, %v3438_v25  ;;  %v1180_v63 = vand.u32 65535, %v3444_v50  ;;  %v1150_v50 = vand.u32 65535, %v3462_v38 }
 0x476   : > { %v3518_v35 = vpop.xlane.xlu0 %1079  ;;  %v3520_v21 = vpop.xlane.xlu1 %1244  ;;  %v1092_v24 = vcvt.s32.f32 %v1090_v31 }
 0x477   : > { %vm1081_vm2 = vcmp.eq.f32.partialorder %v3398_v22, %v3518_v35  ;;  %vm1246_vm15 = vcmp.eq.f32.partialorder %v3400_v43, %v3520_v21  ;;  %v1210_v43 = vand.u32 65535, %v3427_v3  ;;  %v1182_v25 = vcvt.s32.f32 %v1180_v63 }
 0x478   : > { %v1082_v52 = vsel %vm1081_vm2, %v1077_v53, inf  ;;  %v1247_v28 = vsel %vm1246_vm15, %v1242_v2, inf  ;;  %v1137_v2 = vcvt.s32.f32 %v1135_v56  ;;  %v1152_v19 = vcvt.s32.f32 %v1150_v50 }
 0x479   : > { %1083 = vmin.xlane.f32.xlu0 %v1082_v52  ;;  %1248 = vmin.xlane.f32.xlu1 %v1247_v28  ;;  %v1212_v1 = vcvt.s32.f32 %v1210_v43 }
 0x47a   : > { %v3528_v17 = vpop.xlane.xlu0 %1199 }
 0x47b   : > { %vm1201_vm3 = vcmp.eq.f32.partialorder %v3414_v54, %v3528_v17  ;;  %v3533_v15 = vpop.xlane.xlu1 %1094 }
 0x47c   : > { %v1202_v22 = vsel %vm1201_vm3, %v1197_v59, inf  ;;  %vm1096_vm15 = vcmp.eq.f32.partialorder %v3424_v8, %v3533_v15 }
 0x47d   : > { %1203 = vmin.xlane.f32.xlu0 %v1202_v22  ;;  %v1097_v46 = vsel %vm1096_vm15, %v1092_v24, inf  ;;  %v1270_v22 = vand.u32 65535, %v3480_v36 }
 0x47e   : > { %1098 = vmin.xlane.f32.xlu1 %v1097_v46 }
 0x47f   : > { %v3538_v40 = vpop.xlane.xlu0 %1169  ;;  %v3541_v54 = vpop.xlane.xlu1 %1214  ;;  %v1272_v46 = vcvt.s32.f32 %v1270_v22  ;;  %v1206_v22 = vcvt.f32.s32 %v3528_v17 }
 0x480   : > { %vm1171_vm0 = vcmp.eq.f32.partialorder %v3435_v51, %v3538_v40  ;;  %vm1216_vm2 = vcmp.eq.f32.partialorder %v3441_v30, %v3541_v54  ;;  %v1255_v51 = vand.u32 65535, %v3459_v9 }
 0x481   : > { %v1172_v3 = vsel %vm1171_vm0, %v1167_v37, inf  ;;  %v1217_v8 = vsel %vm1216_vm2, %v1212_v1, inf  ;;  %v1236_v1 = vcvt.f32.s32 %v3508_v55 }
 0x482   : > { %1173 = vmin.xlane.f32.xlu0 %v1172_v3  ;;  %1218 = vmin.xlane.f32.xlu1 %v1217_v8  ;;  %v1257_v59 = vcvt.s32.f32 %v1255_v51  ;;  %v1251_v51 = vcvt.f32.s32 %v3520_v21  ;;  %v965_v21 = vsel %vm949_vm6, %v2869_v6, 0.0 }
 0x483   : > { %v3548_v53 = vpop.xlane.xlu0 %1139  ;;  %v3550_v26 = vpop.xlane.xlu1 %1184 }
 0x484   : > { %vm1141_vm3 = vcmp.eq.f32.partialorder %v3452_v33, %v3548_v53  ;;  %vm1186_vm15 = vcmp.eq.f32.partialorder %v3456_v60, %v3550_v26  ;;  %v1285_v33 = vand.u32 65535, %v3477_v47  ;;  %v1300_v47 = vand.u32 65535, %v3493_v61 }
 0x485   : > { %v1142_v52 = vsel %vm1141_vm3, %v1137_v2, inf  ;;  %v1187_v30 = vsel %vm1186_vm15, %v1182_v25, inf  ;;  %v1116_v61 = vcvt.f32.s32 %v3502_v42  ;;  %v964_v2 = vsel %vm948_vm4, %v2859_v62, 0.0 }
 0x486   : > { %1143 = vmin.xlane.f32.xlu0 %v1142_v52  ;;  %1188 = vmin.xlane.f32.xlu1 %v1187_v30  ;;  %v1287_v43 = vcvt.s32.f32 %v1285_v33  ;;  %v1302_v37 = vcvt.s32.f32 %v1300_v47  ;;  %v1237_v25 = vshll.u32 %v1236_v1, 16  ;;  %v1252_v33 = vshll.u32 %v1251_v51, 16 }
 0x487   : > { %v3558_v28 = vpop.xlane.xlu0 %1259  ;;  %v3560_v31 = vpop.xlane.xlu1 %1154  ;;  %v1117_v63 = vshll.u32 %v1116_v61, 16  ;;  %v1101_v47 = vcvt.f32.s32 %v3533_v15  ;;  %v1191_v45 = vcvt.f32.s32 %v3550_v26 }
 0x488   : > { %vm1261_vm0 = vcmp.eq.f32.partialorder %v3472_v39, %v3558_v28  ;;  %vm1156_vm2 = vcmp.eq.f32.partialorder %v3474_v34, %v3560_v31  ;;  %v1266_v26 = vcvt.f32.s32 %v3558_v28 }
 0x489   : > { %v1262_v38 = vsel %vm1261_vm0, %v1257_v59, inf  ;;  %v1157_v9 = vsel %vm1156_vm2, %v1152_v19, inf  ;;  %v1102_v1 = vshll.u32 %v1101_v47, 16  ;;  %v1192_v41 = vshll.u32 %v1191_v45, 16  ;;  %v3903_v47 = vld [vmem:[#allocation18_spill] sm:$0xff] }
 0x48a   : > { %1263 = vmin.xlane.f32.xlu0 %v1262_v38  ;;  %1158 = vmin.xlane.f32.xlu1 %v1157_v9 }
 0x48b   : > { %v3568_v60 = vpop.xlane.xlu0 %1289  ;;  %v3570_v24 = vpop.xlane.xlu1 %1274 }
 0x48c   : > { %vm1291_vm3 = vcmp.eq.f32.partialorder %v3488_v20, %v3568_v60  ;;  %vm1276_vm15 = vcmp.eq.f32.partialorder %v3490_v29, %v3570_v24  ;;  %v1131_v29 = vcvt.f32.s32 %v3510_v4 }
 0x48d   : > { %v1292_v36 = vsel %vm1291_vm3, %v1287_v43, inf  ;;  %v1277_v39 = vsel %vm1276_vm15, %v1272_v46, inf }
 0x48e   : > { %1293 = vmin.xlane.f32.xlu0 %v1292_v36  ;;  %1278 = vmin.xlane.f32.xlu1 %v1277_v39  ;;  %v1132_v52 = vshll.u32 %v1131_v29, 16  ;;  %v962_v36 = vsel %vm946_vm7, %v2867_v5, 0.0  ;;  %v970_v29 = vsel %vm954_vm9, %v2877_v12, 0.0 }
 0x48f   : > { %v3577_v34 = vpop.xlane.xlu1 %1304 }
 0x490   : > { %vm1306_vm0 = vcmp.eq.f32.partialorder %v3498_v58, %v3577_v34  ;;  %v1086_v58 = vcvt.f32.s32 %v3518_v35 }
 0x491   : > { %v1307_v56 = vsel %vm1306_vm0, %v1302_v37, inf  ;;  %v1176_v37 = vcvt.f32.s32 %v3538_v40 }
 0x492   : > { %1308 = vmin.xlane.f32.xlu1 %v1307_v56  ;;  %v1087_v19 = vshll.u32 %v1086_v58, 16 }
 0x4fe   : > { %v1114_v20 = vpop.xlane.xlu0 %1113 }
 0x4ff   : > { %v1115_v3 = vcvt.f32.s32 %v1114_v20  ;;  %v1221_v20 = vcvt.f32.s32 %v3541_v54  ;;  %v1177_v54 = vshll.u32 %v1176_v37, 16 }
 0x501   : > { %v1118_v8 = vadd.s32 %v1117_v63, %v1115_v3  ;;  %v1146_v3 = vcvt.f32.s32 %v3548_v53  ;;  %v1222_v58 = vshll.u32 %v1221_v20, 16  ;;  %v968_v53 = vsel %vm952_vm11, %v2887_v18, 0.0 }
 0x502   : > { %v1234_v50 = vpop.xlane.xlu0 %1233  ;;  %v1129_v42 = vpop.xlane.xlu1 %1128 }
 0x503   : > { %vm1316_vm2 = vcmp.eq.s32.totalorder %v2923_v44, %v1118_v8  ;;  %v1235_v55 = vcvt.f32.s32 %v1234_v50  ;;  %v1130_v30 = vcvt.f32.s32 %v1129_v42 }
 0x504   : > { %v1332_v4 = vsel %vm1316_vm2, %v2859_v62, %v964_v2 }
 0x505   : > { %1348 = vst.msk [vmem:[#allocation2 + $0x10] sm:$0xff] %vm625_vm1, %v1332_v4  ;;  %v1238_v59 = vadd.s32 %v1237_v25, %v1235_v55  ;;  %v1133_v35 = vadd.s32 %v1132_v52, %v1130_v30  ;;  %v1147_v55 = vshll.u32 %v1146_v3, 16 }
 0x506   : > { %v1084_v38 = vpop.xlane.xlu0 %1083  ;;  %v1249_v62 = vpop.xlane.xlu1 %1248 }
 0x507   : > { %vm1324_vm4 = vcmp.eq.s32.totalorder %v2923_v44, %v1238_v59  ;;  %vm1317_vm3 = vcmp.eq.s32.totalorder %v2923_v44, %v1133_v35  ;;  %v1085_v11 = vcvt.f32.s32 %v1084_v38  ;;  %v1250_v9 = vcvt.f32.s32 %v1249_v62  ;;  %v3901_v35 = vld [vmem:[#allocation17_spill] sm:$0xff] }
 0x508   : > { %v1340_v43 = vsel %vm1324_vm4, %v2861_v0, %v972_v23  ;;  %v1333_v46 = vsel %vm1317_vm3, %v2869_v6, %v965_v21  ;;  %v973_v0 = vsel %vm957_vm8, %v2873_v10, 0.0  ;;  %v1207_v6 = vshll.u32 %v1206_v22, 16 }
 0x509   : > { %1356 = vst.msk [vmem:[#allocation2 + $0x50] sm:$0xff] %vm625_vm1, %v1340_v43  ;;  %1349 = vst.msk [vmem:[#allocation2 + $0x18] sm:$0xff] %vm625_vm1, %v1333_v46  ;;  %v1088_v13 = vadd.s32 %v1087_v19, %v1085_v11  ;;  %v1253_v17 = vadd.s32 %v1252_v33, %v1250_v9  ;;  %v969_v19 = vsel %vm953_vm14, %v3901_v35, 0.0  ;;  %v1267_v33 = vshll.u32 %v1266_v26, 16 }
 0x50a   : > { %v1204_v39 = vpop.xlane.xlu0 %1203  ;;  %v1296_v38 = vcvt.f32.s32 %v3568_v60 }
 0x50b   : > { %vm1314_vm5 = vcmp.eq.s32.totalorder %v2923_v44, %v1088_v13  ;;  %vm1325_vm6 = vcmp.eq.s32.totalorder %v2923_v44, %v1253_v17  ;;  %v1205_v15 = vcvt.f32.s32 %v1204_v39  ;;  %v1099_v57 = vpop.xlane.xlu1 %1098  ;;  %v3904_v13 = vld [vmem:[#allocation24_spill] sm:$0xff] }
 0x50c   : > { %v1330_v56 = vsel %vm1314_vm5, %v2867_v5, %v962_v36  ;;  %v1341_v61 = vsel %vm1325_vm6, %v2873_v10, %v973_v0  ;;  %v1100_v63 = vcvt.f32.s32 %v1099_v57  ;;  %v963_v5 = vsel %vm947_vm10, %v2879_v14, 0.0  ;;  %v3906_v36 = vld [vmem:[#allocation19_spill] sm:$0xff] }
 0x50d   : > { %1346 = vst.msk [vmem:[#allocation2] sm:$0xff] %vm625_vm1, %v1330_v56  ;;  %1357 = vst.msk [vmem:[#allocation2 + $0x58] sm:$0xff] %vm625_vm1, %v1341_v61  ;;  %v1208_v7 = vadd.s32 %v1207_v6, %v1205_v15  ;;  %v1297_v39 = vshll.u32 %v1296_v38, 16  ;;  %v1311_v15 = vcvt.f32.s32 %v3577_v34  ;;  %v3910_v34 = vld [vmem:[#allocation27_spill] sm:$0xff] }
 0x50e   : > { %v1103_v10 = vadd.s32 %v1102_v1, %v1100_v63  ;;  %vm3911_vm2 = vcmp.eq.s32.totalorder %v2923_v44, %v3910_v34 }
 0x50f   : > { %vm1322_vm7 = vcmp.eq.s32.totalorder %v2923_v44, %v1208_v7  ;;  %v1174_v40 = vpop.xlane.xlu0 %1173  ;;  %v1219_v25 = vpop.xlane.xlu1 %1218 }
 0x510   : > { %v1338_v8 = vsel %vm1322_vm7, %v2877_v12, %v970_v29  ;;  %v1175_v2 = vcvt.f32.s32 %v1174_v40  ;;  %vm1315_vm8 = vcmp.eq.s32.totalorder %v2923_v44, %v1103_v10  ;;  %v1220_v49 = vcvt.f32.s32 %v1219_v25  ;;  %v3909_v29 = vld [vmem:[#allocation20_spill] sm:$0xff]  ;;  %v3912_v10 = vld [vmem:[#allocation21_spill] sm:$0xff]  ;;  %v3913_v40 = vld [vmem:[#allocation26_spill] sm:$0xff] }
 0x511   : > { %1354 = vst.msk [vmem:[#allocation2 + $0x40] sm:$0xff] %vm625_vm1, %v1338_v8  ;;  %v1331_v51 = vsel %vm1315_vm8, %v2879_v14, %v963_v5  ;;  %v971_v12 = vsel %vm955_vm12, %v2883_v16, 0.0  ;;  %v1161_v14 = vcvt.f32.s32 %v3560_v31  ;;  %v966_v31 = vsel %vm950_vm13, %v2901_v32, 0.0 }
 0x512   : > { %v1178_v50 = vadd.s32 %v1177_v54, %v1175_v2  ;;  %1347 = vst.msk [vmem:[#allocation2 + $0x8] sm:$0xff] %vm625_vm1, %v1331_v51  ;;  %v1223_v42 = vadd.s32 %v1222_v58, %v1220_v49  ;;  %vm3905_vm13 = vcmp.eq.s32.totalorder %v2923_v44, %v3904_v13  ;;  %v976_v5 = vsel %vm3911_vm2, %v3909_v29, 0.0  ;;  %v3915_v49 = vld [vmem:[#allocation22_spill] sm:$0xff]  ;;  %v3916_v51 = vld [vmem:[#allocation28_spill] sm:$0xff] }
 0x513   : > { %v1144_v52 = vpop.xlane.xlu0 %1143  ;;  %v1189_v4 = vpop.xlane.xlu1 %1188  ;;  %v1162_v22 = vshll.u32 %v1161_v14, 16  ;;  %v967_v60 = vsel %vm3905_vm13, %v3903_v47, 0.0  ;;  %vm3914_vm4 = vcmp.eq.s32.totalorder %v2923_v44, %v3913_v40  ;;  %v1312_v8 = vshll.u32 %v1311_v15, 16 }
 0x514   : > { %vm1320_vm9 = vcmp.eq.s32.totalorder %v2923_v44, %v1178_v50  ;;  %v1145_v30 = vcvt.f32.s32 %v1144_v52  ;;  %vm1323_vm10 = vcmp.eq.s32.totalorder %v2923_v44, %v1223_v42  ;;  %v1190_v48 = vcvt.f32.s32 %v1189_v4 }
 0x515   : > { %v1336_v23 = vsel %vm1320_vm9, %v2887_v18, %v968_v53  ;;  %v1339_v28 = vsel %vm1323_vm10, %v2883_v16, %v971_v12  ;;  %v1281_v16 = vcvt.f32.s32 %v3570_v24  ;;  %v975_v54 = vsel %vm3914_vm4, %v3912_v10, 0.0 }
 0x516   : > { %1352 = vst.msk [vmem:[#allocation2 + $0x30] sm:$0xff] %vm625_vm1, %v1336_v23  ;;  %v1148_v59 = vadd.s32 %v1147_v55, %v1145_v30  ;;  %1355 = vst.msk [vmem:[#allocation2 + $0x48] sm:$0xff] %vm625_vm1, %v1339_v28  ;;  %v1193_v18 = vadd.s32 %v1192_v41, %v1190_v48  ;;  %vm3917_vm6 = vcmp.eq.s32.totalorder %v2923_v44, %v3916_v51 }
 0x517   : > { %v1264_v62 = vpop.xlane.xlu0 %1263  ;;  %v1159_v11 = vpop.xlane.xlu1 %1158  ;;  %v1282_v6 = vshll.u32 %v1281_v16, 16  ;;  %v977_v50 = vsel %vm3917_vm6, %v3915_v49, 0.0 }
 0x518   : > { %vm1318_vm11 = vcmp.eq.s32.totalorder %v2923_v44, %v1148_v59  ;;  %vm1321_vm12 = vcmp.eq.s32.totalorder %v2923_v44, %v1193_v18  ;;  %v1265_v9 = vcvt.f32.s32 %v1264_v62  ;;  %v1160_v43 = vcvt.f32.s32 %v1159_v11 }
 0x519   : > { %v1334_v27 = vsel %vm1318_vm11, %v2901_v32, %v966_v31  ;;  %v1337_v46 = vsel %vm1321_vm12, %v3901_v35, %v969_v19  ;;  %v3907_v32 = vld [vmem:[#allocation25_spill] sm:$0xff] }
 0x51a   : > { %1350 = vst.msk [vmem:[#allocation2 + $0x20] sm:$0xff] %vm625_vm1, %v1334_v27  ;;  %1353 = vst.msk [vmem:[#allocation2 + $0x38] sm:$0xff] %vm625_vm1, %v1337_v46  ;;  %v1268_v24 = vadd.s32 %v1267_v33, %v1265_v9  ;;  %v1163_v17 = vadd.s32 %v1162_v22, %v1160_v43  ;;  %vm3908_vm14 = vcmp.eq.s32.totalorder %v2923_v44, %v3907_v32 }
 0x51b   : > { %v974_v0 = vsel %vm3908_vm14, %v3906_v36, 0.0  ;;  %v1294_v37 = vpop.xlane.xlu0 %1293  ;;  %v1279_v56 = vpop.xlane.xlu1 %1278 }
 0x51c   : > { %vm1326_vm15 = vcmp.eq.s32.totalorder %v2923_v44, %v1268_v24  ;;  %vm1319_vm0 = vcmp.eq.s32.totalorder %v2923_v44, %v1163_v17  ;;  %v1295_v61 = vcvt.f32.s32 %v1294_v37  ;;  %v1280_v57 = vcvt.f32.s32 %v1279_v56 }
 0x51d   : > { %v1342_v1 = vsel %vm1326_vm15, %v3906_v36, %v974_v0  ;;  %v1335_v20 = vsel %vm1319_vm0, %v3903_v47, %v967_v60 }
 0x51e   : > { %1358 = vst.msk [vmem:[#allocation2 + $0x60] sm:$0xff] %vm625_vm1, %v1342_v1  ;;  %1351 = vst.msk [vmem:[#allocation2 + $0x28] sm:$0xff] %vm625_vm1, %v1335_v20  ;;  %v1298_v7 = vadd.s32 %v1297_v39, %v1295_v61  ;;  %v1283_v63 = vadd.s32 %v1282_v6, %v1280_v57 }
 0x51f   : > { %v1309_v3 = vpop.xlane.xlu1 %1308 }
 0x520   : > { %vm1328_vm3 = vcmp.eq.s32.totalorder %v2923_v44, %v1298_v7  ;;  %vm1327_vm5 = vcmp.eq.s32.totalorder %v2923_v44, %v1283_v63  ;;  %v1310_v2 = vcvt.f32.s32 %v1309_v3 }
 0x521   : > { %v1344_v25 = vsel %vm1328_vm3, %v3909_v29, %v976_v5  ;;  %v1343_v58 = vsel %vm1327_vm5, %v3912_v10, %v975_v54 }
 0x522   : > { %1360 = vst.msk [vmem:[#allocation2 + $0x70] sm:$0xff] %vm625_vm1, %v1344_v25  ;;  %1359 = vst.msk [vmem:[#allocation2 + $0x68] sm:$0xff] %vm625_vm1, %v1343_v58  ;;  %v1313_v45 = vadd.s32 %v1312_v8, %v1310_v2 }
 0x524   : > { %vm1329_vm7 = vcmp.eq.s32.totalorder %v2923_v44, %v1313_v45 }
 0x525   : > { %v1345_v53 = vsel %vm1329_vm7, %v3915_v49, %v977_v50 }
 0x526   : > { %1361 = vst.msk [vmem:[#allocation2 + $0x78] sm:$0xff] %vm625_vm1, %v1345_v53 }
 0x527 PF: > { %v2374_v12 = vld [vmem:[%s273_s15] sm:$0xff]   ;;  %v2375_v26 = vld [vmem:[%s273_s15 + $0x8] sm:$0xff]   ;;  %vm1523_vm8 = vcmask 261120   ;;  %v1378_v28 = vlaneseq  ;;  %v1380_v31 = vstv %s2582_s18  ;;  %vm1398_vm1 = vcmask 64512   ;;  %p1866_p7 = scmp.eq.s32.totalorder %s2582_s18, 7 }
 0x528   : > { %2163 = vmatprep.subr.bf16.mxu0 %v2374_v12  ;;  %v2376_v42 = vld [vmem:[#allocation4] sm:$0xff]   ;;  %v2377_v44 = vld [vmem:[#allocation4 + $0x8] sm:$0xff]   ;;  %v2378_v52 = vld [vmem:[#allocation4 + $0x10] sm:$0xff]  }
 0x529   : > { %2164 = vmatpush3.bf16.msra.mxu0 %v2374_v12  ;;  %2167 = vmatprep.mubr.msk.bf16.mxu0 %vm1523_vm8, %v2376_v42  ;;  %v2379_v55 = vld [vmem:[#allocation4 + $0x18] sm:$0xff]   ;;  %v2380_v14 = vld [vmem:[#allocation4 + $0x20] sm:$0xff]   ;;  %v2381_v30 = vld [vmem:[#allocation4 + $0x28] sm:$0xff]   ;;  %v1379_v35 = vand.u32 127, %v1378_v28 }
 0x52a   : > { %2165 = vmatprep.subr.bf16.mxu0 %v2375_v26  ;;  %v2382_v4 = vld [vmem:[#allocation4 + $0x30] sm:$0xff]   ;;  %v2383_v41 = vld [vmem:[#allocation4 + $0x38] sm:$0xff]   ;;  %v1362_v59 = vld [vmem:[#allocation2] sm:$0xff] }
 0x52b   : > { %v2384_v23 = vld [vmem:[%s282_s25] sm:$0xff]   ;;  %v2385_v48 = vld [vmem:[%s282_s25 + $0x8] sm:$0xff]   ;;  %vm3726_vm9 = vcmp.eq.s32.totalorder %v1379_v35, %v1380_v31 }
 0x52c   : > { %2183 = vmatprep.subr.bf16.mxu1 %v2384_v23  ;;  %v1364_v21 = vld [vmem:[#allocation2 + $0x10] sm:$0xff]  ;;  %v1363_v19 = vld [vmem:[#allocation2 + $0x8] sm:$0xff]  ;;  %v1365_v33 = vld [vmem:[#allocation2 + $0x18] sm:$0xff]  ;;  %v1382_v22 = vsel %vm3726_vm9, %v1362_v59, 0.0 }
 0x52d   : > { %2166 = vmatpush3.bf16.msra.mxu0 %v2375_v26  ;;  %2184 = vmatpush3.bf16.msra.mxu1 %v2384_v23  ;;  %v1384_v38 = vsel %vm3726_vm9, %v1364_v21, 0.0  ;;  %v1383_v16 = vsel %vm3726_vm9, %v1363_v19, 0.0  ;;  %v1385_v62 = vsel %vm3726_vm9, %v1365_v33, 0.0  ;;  %v1399_v11 = vsel %vm1398_vm1, %v1382_v22, 0.0  ;;  %v1366_v9 = vld [vmem:[#allocation2 + $0x20] sm:$0xff]  ;;  %v1367_v43 = vld [vmem:[#allocation2 + $0x28] sm:$0xff] }
 0x52e   : > { %2185 = vmatprep.subr.bf16.mxu1 %v2385_v48  ;;  %v1405_v27 = vsel %vm1398_vm1, %v1384_v38, 0.0  ;;  %1400 = vadd.xlane.f32.xlu0 %v1399_v11  ;;  %v1402_v46 = vsel %vm1398_vm1, %v1383_v16, 0.0  ;;  %v1408_v47 = vsel %vm1398_vm1, %v1385_v62, 0.0  ;;  %v1386_v13 = vsel %vm3726_vm9, %v1366_v9, 0.0  ;;  %v1368_v24 = vld [vmem:[#allocation2 + $0x30] sm:$0xff]  ;;  %v1369_v17 = vld [vmem:[#allocation2 + $0x38] sm:$0xff] }
 0x52f   : > { %1406 = vadd.xlane.f32.xlu1 %v1405_v27  ;;  %v1387_v60 = vsel %vm3726_vm9, %v1367_v43, 0.0  ;;  %v1411_v36 = vsel %vm1398_vm1, %v1386_v13, 0.0  ;;  %v1388_v0 = vsel %vm3726_vm9, %v1368_v24, 0.0  ;;  %v1389_v39 = vsel %vm3726_vm9, %v1369_v17, 0.0  ;;  %v1370_v6 = vld [vmem:[#allocation2 + $0x40] sm:$0xff]  ;;  %v1371_v15 = vld [vmem:[#allocation2 + $0x48] sm:$0xff] }
 0x530   : > { %2168 = vmatmul.mubr.msk.bf16.vlgmr.msra.gmra.mrb[0].mxu0 %vm1523_vm8, %v2377_v44  ;;  %v1414_v32 = vsel %vm1398_vm1, %v1387_v60, 0.0  ;;  %v1417_v37 = vsel %vm1398_vm1, %v1388_v0, 0.0  ;;  %v1420_v56 = vsel %vm1398_vm1, %v1389_v39, 0.0  ;;  %v1390_v61 = vsel %vm3726_vm9, %v1370_v6, 0.0  ;;  %v1372_v1 = vld [vmem:[#allocation2 + $0x50] sm:$0xff]  ;;  %v1373_v20 = vld [vmem:[#allocation2 + $0x58] sm:$0xff] }
 0x531   : > { %2171 = vmatprep.mubr.msk.bf16.mxu0 %vm1523_vm8, %v2378_v52  ;;  %2186 = vmatpush3.bf16.msra.mxu1 %v2385_v48  ;;  %v1391_v57 = vsel %vm3726_vm9, %v1371_v15, 0.0  ;;  %v1423_v7 = vsel %vm1398_vm1, %v1390_v61, 0.0  ;;  %v1392_v29 = vsel %vm3726_vm9, %v1372_v1, 0.0  ;;  %v1393_v34 = vsel %vm3726_vm9, %v1373_v20, 0.0  ;;  %v1374_v5 = vld [vmem:[#allocation2 + $0x60] sm:$0xff]  ;;  %v1375_v10 = vld [vmem:[#allocation2 + $0x68] sm:$0xff] }
 0x532   : > { %1403 = vadd.xlane.f32.xlu0 %v1402_v46  ;;  %v1426_v63 = vsel %vm1398_vm1, %v1391_v57, 0.0  ;;  %v1429_v40 = vsel %vm1398_vm1, %v1392_v29, 0.0  ;;  %v1432_v54 = vsel %vm1398_vm1, %v1393_v34, 0.0  ;;  %v1394_v3 = vsel %vm3726_vm9, %v1374_v5, 0.0  ;;  %v1376_v2 = vld [vmem:[#allocation2 + $0x70] sm:$0xff]  ;;  %v1377_v25 = vld [vmem:[#allocation2 + $0x78] sm:$0xff] }
 0x533   : > { %1409 = vadd.xlane.f32.xlu1 %v1408_v47  ;;  %v1395_v8 = vsel %vm3726_vm9, %v1375_v10, 0.0  ;;  %v1435_v58 = vsel %vm1398_vm1, %v1394_v3, 0.0  ;;  %v1396_v49 = vsel %vm3726_vm9, %v1376_v2, 0.0  ;;  %v1397_v51 = vsel %vm3726_vm9, %v1377_v25, 0.0  ;;  %v1661_v10 = vld [vmem:[#allocation3] sm:$0xff] }
 0x534   : > { %v1438_v45 = vsel %vm1398_vm1, %v1395_v8, 0.0  ;;  %v1441_v50 = vsel %vm1398_vm1, %v1396_v49, 0.0  ;;  %v1444_v53 = vsel %vm1398_vm1, %v1397_v51, 0.0  ;;  %v1664_v8 = vld [vmem:[#allocation3 + $0x18] sm:$0xff] }
 0x536   : > { %1412 = vadd.xlane.f32.xlu0 %v1411_v36 }
 0x537   : > { %1415 = vadd.xlane.f32.xlu1 %v1414_v32 }
 0x538   : > { %2172 = vmatmul.mubr.msk.bf16.gmra.mrb[4].mxu0 %vm1523_vm8, %v2379_v55 }
 0x539   : > { %2175 = vmatprep.mubr.msk.bf16.mxu0 %vm1523_vm8, %v2380_v14 }
 0x53a   : > { %1418 = vadd.xlane.f32.xlu0 %v1417_v37 }
 0x53b   : > { %1421 = vadd.xlane.f32.xlu1 %v1420_v56 }
 0x53e   : > { %1424 = vadd.xlane.f32.xlu0 %v1423_v7 }
 0x53f   : > { %1427 = vadd.xlane.f32.xlu1 %v1426_v63  ;;  %v1663_v63 = vld [vmem:[#allocation3 + $0x10] sm:$0xff] }
 0x540   : > { %2176 = vmatmul.mubr.msk.bf16.gmra.mrb[8].mxu0 %vm1523_vm8, %v2381_v30 }
 0x541   : > { %2179 = vmatprep.mubr.msk.bf16.mxu0 %vm1523_vm8, %v2382_v4 }
 0x542   : > { %1430 = vadd.xlane.f32.xlu0 %v1429_v40 }
 0x543   : > { %1433 = vadd.xlane.f32.xlu1 %v1432_v54 }
 0x546   : > { %1436 = vadd.xlane.f32.xlu0 %v1435_v58  ;;  %v1662_v58 = vld [vmem:[#allocation3 + $0x8] sm:$0xff] }
 0x547   : > { %1439 = vadd.xlane.f32.xlu1 %v1438_v45 }
 0x548   : > { %2180 = vmatmul.mubr.msk.bf16.gmra.mrb[12].mxu0 %vm1523_vm8, %v2383_v41 }
 0x54a   : > { %1442 = vadd.xlane.f32.xlu0 %v1441_v50 }
 0x54b   : > { %1445 = vadd.xlane.f32.xlu1 %v1444_v53 }
 0x5bb   : > { %v1401_v37 = vpop.xlane.xlu0 %1400 }
 0x5bc   : > { %v1407_v56 = vpop.xlane.xlu1 %1406 }
 0x5bf   : > { %v1404_v61 = vpop.xlane.xlu0 %1403 }
 0x5c0   : > { %v1410_v57 = vpop.xlane.xlu1 %1409 }
 0x5c3   : > { %v1413_v1 = vpop.xlane.xlu0 %1412 }
 0x5c4   : > { %v1416_v20 = vpop.xlane.xlu1 %1415 }
 0x5c7   : > { %v1419_v7 = vpop.xlane.xlu0 %1418 }
 0x5c8   : > { %v1422_v34 = vpop.xlane.xlu1 %1421 }
 0x5cb   : > { %v1425_v50 = vpop.xlane.xlu0 %1424 }
 0x603   : > { %v2169_v12 = vpop.f32.mrb[0].mxu0 }
 0x604   : > { %v1582_v26 = vpop.f32.mrb[1].mxu0  ;;  %v1647_v44 = vmax.f32 %v2169_v12, 0.0 }
 0x605   : > { %v2170_v42 = vpop.f32.mrb[2].mxu0  ;;  %v1645_v14 = vmax.f32 %v1582_v26, 0.0  ;;  %v1428_v26 = vpop.xlane.xlu1 %1427 }
 0x606   : > { %v1648_v52 = vmax.f32 %v2170_v42, 0.0  ;;  %v1585_v55 = vpop.f32.mrb[3].mxu0 }
 0x607   : > { %v1646_v30 = vmax.f32 %v1585_v55, 0.0  ;;  %v1665_v55 = vld [vmem:[#allocation3 + $0x20] sm:$0xff] }
 0x608   : > { %v1678_v4 = vpack.c.bf16 %v1648_v52, %v1647_v44  ;;  %v1667_v44 = vld [vmem:[#allocation3 + $0x30] sm:$0xff] }
 0x609   : > { %v1677_v41 = vpack.c.bf16 %v1646_v30, %v1645_v14 }
 0x60b   : > { %v2173_v23 = vpop.f32.mrb[4].mxu0  ;;  %2187 = vmatprep.mubr.msk.bf16.mxu1 %vm1523_vm8, %v1677_v41  ;;  %v1668_v41 = vld [vmem:[#allocation3 + $0x38] sm:$0xff] }
 0x60c   : > { %v1598_v48 = vpop.f32.mrb[5].mxu0  ;;  %2188 = vmatmul.mubr.msk.bf16.vlgmr.msra.gmra.mrb[0].mxu1 %vm1523_vm8, %v1678_v4  ;;  %v1651_v59 = vmax.f32 %v2173_v23, 0.0  ;;  %v1431_v23 = vpop.xlane.xlu0 %1430 }
 0x60d   : > { %v2174_v28 = vpop.f32.mrb[6].mxu0  ;;  %v1649_v21 = vmax.f32 %v1598_v48, 0.0 }
 0x60e   : > { %v1652_v31 = vmax.f32 %v2174_v28, 0.0  ;;  %v1601_v35 = vpop.f32.mrb[7].mxu0 }
 0x60f   : > { %v1650_v19 = vmax.f32 %v1601_v35, 0.0 }
 0x610   : > { %v1680_v33 = vpack.c.bf16 %v1652_v31, %v1651_v59  ;;  %v1666_v59 = vld [vmem:[#allocation3 + $0x28] sm:$0xff] }
 0x611   : > { %v1679_v18 = vpack.c.bf16 %v1650_v19, %v1649_v21  ;;  %v1434_v19 = vpop.xlane.xlu1 %1433 }
 0x613   : > { %v2177_v22 = vpop.f32.mrb[8].mxu0  ;;  %2191 = vmatprep.mubr.msk.bf16.mxu1 %vm1523_vm8, %v1679_v18 }
 0x614   : > { %v1614_v38 = vpop.f32.mrb[9].mxu0  ;;  %2192 = vmatmul.mubr.msk.bf16.gmra.mrb[4].mxu1 %vm1523_vm8, %v1680_v33  ;;  %v1655_v62 = vmax.f32 %v2177_v22, 0.0 }
 0x615   : > { %v2178_v16 = vpop.f32.mrb[10].mxu0  ;;  %v1653_v9 = vmax.f32 %v1614_v38, 0.0  ;;  %v1671_v38 = vld [vmem:[#allocation3 + $0x50] sm:$0xff] }
 0x616   : > { %v1656_v11 = vmax.f32 %v2178_v16, 0.0  ;;  %v1617_v27 = vpop.f32.mrb[11].mxu0  ;;  %v1437_v16 = vpop.xlane.xlu0 %1436 }
 0x617   : > { %v1654_v43 = vmax.f32 %v1617_v27, 0.0 }
 0x618   : > { %v1682_v46 = vpack.c.bf16 %v1656_v11, %v1655_v62  ;;  %v1669_v11 = vld [vmem:[#allocation3 + $0x40] sm:$0xff] }
 0x619   : > { %v1681_v47 = vpack.c.bf16 %v1654_v43, %v1653_v9 }
 0x61b   : > { %v2181_v13 = vpop.f32.mrb[12].mxu0  ;;  %2195 = vmatprep.mubr.msk.bf16.mxu1 %vm1523_vm8, %v1681_v47  ;;  %v1440_v47 = vpop.xlane.xlu1 %1439 }
 0x61c   : > { %v1630_v60 = vpop.f32.mrb[13].mxu0  ;;  %2196 = vmatmul.mubr.msk.bf16.gmra.mrb[8].mxu1 %vm1523_vm8, %v1682_v46  ;;  %v1659_v17 = vmax.f32 %v2181_v13, 0.0  ;;  %v1672_v46 = vld [vmem:[#allocation3 + $0x58] sm:$0xff] }
 0x61d   : > { %v2182_v24 = vpop.f32.mrb[14].mxu0  ;;  %v1657_v0 = vmax.f32 %v1630_v60, 0.0 }
 0x61e   : > { %v1660_v36 = vmax.f32 %v2182_v24, 0.0  ;;  %v1633_v32 = vpop.f32.mrb[15].mxu0  ;;  %v1670_v24 = vld [vmem:[#allocation3 + $0x48] sm:$0xff] }
 0x61f   : > { %v1658_v39 = vmax.f32 %v1633_v32, 0.0 }
 0x620   : > { %v1684_v6 = vpack.c.bf16 %v1660_v36, %v1659_v17 }
 0x621   : > { %v1683_v15 = vpack.c.bf16 %v1658_v39, %v1657_v0 }
 0x623   : > { %2199 = vmatprep.mubr.msk.bf16.mxu1 %vm1523_vm8, %v1683_v15 }
 0x624   : > { %2200 = vmatmul.mubr.msk.bf16.gmra.mrb[12].mxu1 %vm1523_vm8, %v1684_v6  ;;  %v1443_v6 = vpop.xlane.xlu0 %1442 }
 0x6df   : > { %v2189_v29 = vpop.f32.mrb[0].mxu1 }
 0x6e0   : > { %v1820_v5 = vmul.f32 %v2189_v29, %v1407_v56  ;;  %v1755_v40 = vpop.f32.mrb[1].mxu1  ;;  %v1446_v56 = vpop.xlane.xlu1 %1445 }
 0x6e1   : > { %v1818_v54 = vmul.f32 %v1755_v40, %v1401_v37  ;;  %v2190_v3 = vpop.f32.mrb[2].mxu1  ;;  %v1675_v37 = vld [vmem:[#allocation3 + $0x70] sm:$0xff] }
 0x6e2   : > { %v1836_v2 = vadd.f32 %v1820_v5, %v1663_v63  ;;  %v1821_v25 = vmul.f32 %v2190_v3, %v1410_v57  ;;  %v1758_v45 = vpop.f32.mrb[3].mxu1  ;;  %v1673_v57 = vld [vmem:[#allocation3 + $0x60] sm:$0xff]  ;;  %v1676_v63 = vld [vmem:[#allocation3 + $0x78] sm:$0xff]  ;;  %v1674_v5 = vld [vmem:[#allocation3 + $0x68] sm:$0xff] }
 0x6e3   : > { %v1834_v49 = vadd.f32 %v1818_v54, %v1661_v10  ;;  %v1819_v51 = vmul.f32 %v1758_v45, %v1404_v61 }
 0x6e4   : > { %1852 = vst [vmem:[#allocation3 + $0x10] sm:$0xff] %v1836_v2  ;;  %v1837_v53 = vadd.f32 %v1821_v25, %v1664_v8 }
 0x6e5   : > { %1850 = vst [vmem:[#allocation3] sm:$0xff] %v1834_v49  ;;  %v1835_v12 = vadd.f32 %v1819_v51, %v1662_v58 }
 0x6e6   : > { %1853 = vst [vmem:[#allocation3 + $0x18] sm:$0xff] %v1837_v53 }
 0x6e7   : > { %1851 = vst [vmem:[#allocation3 + $0x8] sm:$0xff] %v1835_v12  ;;  %v2193_v42 = vpop.f32.mrb[4].mxu1 }
 0x6e8   : > { %v1824_v52 = vmul.f32 %v2193_v42, %v1419_v7  ;;  %v1771_v14 = vpop.f32.mrb[5].mxu1 }
 0x6e9   : > { %v1822_v30 = vmul.f32 %v1771_v14, %v1413_v1  ;;  %v2194_v4 = vpop.f32.mrb[6].mxu1 }
 0x6ea   : > { %v1840_v48 = vadd.f32 %v1824_v52, %v1667_v44  ;;  %v1825_v28 = vmul.f32 %v2194_v4, %v1422_v34  ;;  %v1774_v31 = vpop.f32.mrb[7].mxu1 }
 0x6eb   : > { %v1838_v35 = vadd.f32 %v1822_v30, %v1665_v55  ;;  %v1823_v21 = vmul.f32 %v1774_v31, %v1416_v20  ;;  %v1873_v58 = vld [vmem:[#allocation3 + $0x10] sm:$0xff] (%p1866_p7) }
 0x6ec   : > { %1856 = vst [vmem:[#allocation3 + $0x30] sm:$0xff] %v1840_v48  ;;  %v1841_v33 = vadd.f32 %v1825_v28, %v1668_v41  ;;  %v1871_v2 = vld [vmem:[#allocation3] sm:$0xff] (%p1866_p7)  ;;  %1889 = vst [vmem:[#allocation11 + $0x10] sm:$0xff] (%p1866_p7), %v1873_v58 }
 0x6ed   : > { %1854 = vst [vmem:[#allocation3 + $0x20] sm:$0xff] %v1838_v35  ;;  %v1839_v18 = vadd.f32 %v1823_v21, %v1666_v59  ;;  %1887 = vst [vmem:[#allocation11] sm:$0xff] (%p1866_p7), %v1871_v2  ;;  %v1874_v45 = vld [vmem:[#allocation3 + $0x18] sm:$0xff] (%p1866_p7) }
 0x6ee   : > { %1857 = vst [vmem:[#allocation3 + $0x38] sm:$0xff] %v1841_v33  ;;  %v1872_v25 = vld [vmem:[#allocation3 + $0x8] sm:$0xff] (%p1866_p7)  ;;  %1890 = vst [vmem:[#allocation11 + $0x18] sm:$0xff] (%p1866_p7), %v1874_v45 }
 0x6ef   : > { %1855 = vst [vmem:[#allocation3 + $0x28] sm:$0xff] %v1839_v18  ;;  %v2197_v22 = vpop.f32.mrb[8].mxu1  ;;  %1888 = vst [vmem:[#allocation11 + $0x8] sm:$0xff] (%p1866_p7), %v1872_v25 }
 0x6f0   : > { %v1828_v62 = vmul.f32 %v2197_v22, %v1431_v23  ;;  %v1787_v27 = vpop.f32.mrb[9].mxu1 }
 0x6f1   : > { %v1826_v9 = vmul.f32 %v1787_v27, %v1425_v50  ;;  %v2198_v43 = vpop.f32.mrb[10].mxu1 }
 0x6f2   : > { %v1844_v13 = vadd.f32 %v1828_v62, %v1671_v38  ;;  %v1829_v60 = vmul.f32 %v2198_v43, %v1434_v19  ;;  %v1790_v17 = vpop.f32.mrb[11].mxu1 }
 0x6f3   : > { %v1842_v36 = vadd.f32 %v1826_v9, %v1669_v11  ;;  %v1827_v32 = vmul.f32 %v1790_v17, %v1428_v26  ;;  %v1877_v50 = vld [vmem:[#allocation3 + $0x30] sm:$0xff] (%p1866_p7) }
 0x6f4   : > { %1860 = vst [vmem:[#allocation3 + $0x50] sm:$0xff] %v1844_v13  ;;  %v1845_v0 = vadd.f32 %v1829_v60, %v1672_v46  ;;  %v1875_v49 = vld [vmem:[#allocation3 + $0x20] sm:$0xff] (%p1866_p7)  ;;  %1893 = vst [vmem:[#allocation11 + $0x30] sm:$0xff] (%p1866_p7), %v1877_v50 }
 0x6f5   : > { %1858 = vst [vmem:[#allocation3 + $0x40] sm:$0xff] %v1842_v36  ;;  %v1843_v39 = vadd.f32 %v1827_v32, %v1670_v24  ;;  %1891 = vst [vmem:[#allocation11 + $0x20] sm:$0xff] (%p1866_p7), %v1875_v49  ;;  %v1878_v53 = vld [vmem:[#allocation3 + $0x38] sm:$0xff] (%p1866_p7) }
 0x6f6   : > { %1861 = vst [vmem:[#allocation3 + $0x58] sm:$0xff] %v1845_v0  ;;  %v1876_v51 = vld [vmem:[#allocation3 + $0x28] sm:$0xff] (%p1866_p7)  ;;  %1894 = vst [vmem:[#allocation11 + $0x38] sm:$0xff] (%p1866_p7), %v1878_v53 }
 0x6f7   : > { %1859 = vst [vmem:[#allocation3 + $0x48] sm:$0xff] %v1843_v39  ;;  %v2201_v15 = vpop.f32.mrb[12].mxu1  ;;  %1892 = vst [vmem:[#allocation11 + $0x28] sm:$0xff] (%p1866_p7), %v1876_v51 }
 0x6f8   : > { %v1832_v61 = vmul.f32 %v2201_v15, %v1443_v6  ;;  %v1803_v1 = vpop.f32.mrb[13].mxu1 }
 0x6f9   : > { %v1830_v20 = vmul.f32 %v1803_v1, %v1437_v16  ;;  %v2202_v7 = vpop.f32.mrb[14].mxu1  ;;  %1870 = sbr.rel (!%p1866_p7) target bundleno = 1800 (0x708), region = 60 }
 0x6fa   : > { %v1848_v29 = vadd.f32 %v1832_v61, %v1675_v37  ;;  %v1833_v34 = vmul.f32 %v2202_v7, %v1446_v56  ;;  %v1806_v10 = vpop.f32.mrb[15].mxu1 }
 0x6fb   : > { %v1846_v40 = vadd.f32 %v1830_v20, %v1673_v57  ;;  %v1831_v54 = vmul.f32 %v1806_v10, %v1440_v47  ;;  %v1881_v42 = vld [vmem:[#allocation3 + $0x50] sm:$0xff] (%p1866_p7) }
 0x6fc   : > { %1864 = vst [vmem:[#allocation3 + $0x70] sm:$0xff] %v1848_v29  ;;  %v1849_v3 = vadd.f32 %v1833_v34, %v1676_v63  ;;  %v1879_v12 = vld [vmem:[#allocation3 + $0x40] sm:$0xff] (%p1866_p7)  ;;  %1897 = vst [vmem:[#allocation11 + $0x50] sm:$0xff] (%p1866_p7), %v1881_v42 }
 0x6fd   : > { %1862 = vst [vmem:[#allocation3 + $0x60] sm:$0xff] %v1846_v40  ;;  %v1847_v8 = vadd.f32 %v1831_v54, %v1674_v5  ;;  %1895 = vst [vmem:[#allocation11 + $0x40] sm:$0xff] (%p1866_p7), %v1879_v12  ;;  %v1882_v44 = vld [vmem:[#allocation3 + $0x58] sm:$0xff] (%p1866_p7) }
 0x6fe   : > { %1865 = vst [vmem:[#allocation3 + $0x78] sm:$0xff] %v1849_v3  ;;  %v1880_v26 = vld [vmem:[#allocation3 + $0x48] sm:$0xff] (%p1866_p7)  ;;  %1898 = vst [vmem:[#allocation11 + $0x58] sm:$0xff] (%p1866_p7), %v1882_v44 }
 0x6ff   : > { %1863 = vst [vmem:[#allocation3 + $0x68] sm:$0xff] %v1847_v8  ;;  %1896 = vst [vmem:[#allocation11 + $0x48] sm:$0xff] (%p1866_p7), %v1880_v26 }
 0x703   : > { %v1885_v14 = vld [vmem:[#allocation3 + $0x70] sm:$0xff] }
 0x704   : > { %v1883_v52 = vld [vmem:[#allocation3 + $0x60] sm:$0xff]  ;;  %1901 = vst [vmem:[#allocation11 + $0x70] sm:$0xff] %v1885_v14 }
 0x705   : > { %1899 = vst [vmem:[#allocation11 + $0x60] sm:$0xff] %v1883_v52  ;;  %v1886_v30 = vld [vmem:[#allocation3 + $0x78] sm:$0xff] }
 0x706   : > { %v1884_v55 = vld [vmem:[#allocation3 + $0x68] sm:$0xff]  ;;  %1902 = vst [vmem:[#allocation11 + $0x78] sm:$0xff] %v1886_v30 }
 0x707   : > { %1900 = vst [vmem:[#allocation11 + $0x68] sm:$0xff] %v1884_v55 }
 0x708 PF: > { %p2242_p0 = scmp.eq.s32.totalorder %s2656_s21, 7  ;;  %s2599_s18 = smov [#allocation11]  }
 0x709   : > { %s1912_s23 = sshll.u32 %s2599_s18, 4  ;;  %s1913_s23 = int_to_ptr.vmem [resolvable:$true] %s1912_s23 }
 0x70a   : > { %s2502_s0 = scalar_lea.vmem %s1913_s23, 2048  ;;  %p2509_p3 = scmp.lt.s32.totalorder %s1913_s23, %s1913_s23 }
 0x70b   : > { %p2503_p12 = scmp.ne.s32.totalorder %s1913_s23, %s2502_s0  ;;  %p2510_p6 = scmp.lt.s32.totalorder %s2502_s0, %s2502_s0 }
 0x70d   : > { %p2504_p2 = pnand %p2503_p12, %p2242_p0  ;;  %p2511_p10 = por %p2510_p6, %p2509_p3 }
 0x70f   : > { %p2505_p9 = pneg %p2504_p2 }
 0x711   : > { %p2512_p11 = pnand %p2511_p10, %p2505_p9 }
 0x713   : > { %2515 = shalt.err (!%p2512_p11)
}
 0x714   : > { %s2516_s9 = scalar_lea.hbm %s3834_s4, 2048 }
 0x715   : > { %p2517_p8 = scmp.ne.s32.totalorder %s3834_s4, %s2516_s9  ;;  %p2522_p13 = scmp.lt.u32.totalorder %s2516_s9, %s3834_s4 }
 0x717   : > { %p2518_p1 = pnand %p2517_p8, %p2242_p0 }
 0x719   : > { %p2519_p4 = pneg %p2518_p1 }
 0x71b   : > { %p2524_p5 = pnand %p2522_p13, %p2519_p4 }
 0x71d   : > { %2527 = shalt.err (!%p2524_p5)
}
 0x71e   : > { %s2600_s7 = smov 128   ;;  %s2601_s10 = smov 8  }
 0x71f   : > { %2220 = dma.vmem_to_hbm [thread:$0]  (%p2242_p0), %s1913_s23, 2048, %s3834_s4, [#allocation6], %s2600_s7, %s2600_s7, %s2601_s10  }
 0x720   : > { %2565 = dma.done.wait (%p2242_p0), [#allocation6], 2048  }
 0x721   : > { %2567 = vsyncadd (%p2242_p0), [#allocation6], 4294965248 }
 0x722 PF: > { %s17_s20 = sadd.s32 1, %s2590_s20   ;;  %s3920_s11 = sld [smem:[#allocation16_spill]] }
 0x723   : > { %p14_p7 = scmp.ge.s32.totalorder %s17_s20, 10   ;;  %s3921_s15 = smov %s2574_s16 }
 0x724   : > { %s3922_s16 = smov %s2578_s17  ;;  %s3923_s17 = smov %s2735_s14 }
 0x725   : > { %s3924_s18 = smov %s2586_s19  ;;  %16 = sbr.rel (!%p14_p7) target bundleno = 8 (0x8), region = 101 }
 0x728   : > { %s3925_s19 = smov %s3920_s11 }
 0x72c   :  { %1928 = vsyncpa [#allocation5], 1 }
 0x72d   :  { %1930 = vsyncpa [#allocation5 + $0x1], 1 }
 0x72e   :  { %1931 = vsyncpa [#allocation8], 1 }
 0x72f   :  { %1932 = vsyncpa [#allocation6], 1 }
 0x730   :  { %1934 = vsyncpa [#allocation6 + $0x1], 1 }

</bundles_post_ra>
